<compile_context>
chip_gen: v5e
topology: v5e:2x2
jax: 0.10.0
libtpu: 0.0.40
codegen_flags: <defaults>
</compile_context>

<pallas_src>
import functools
import math

import jax
import jax.numpy as jnp
from jax.experimental import pallas as pl
from jax.experimental.pallas import tpu as pltpu

# ----------------------------- config (tiny Llama) ---------------------------

CFG = dict(
    vocab=64,
    hidden=32,
    n_layers=2,
    n_heads=4,
    head_dim=8,          # n_heads * head_dim == hidden
    intermediate=64,
    rms_eps=1e-6,
    rope_theta=10000.0,
)

LANE = 128


# ------------------------------- kernel helpers -------------------------------

def _rmsnorm(x, w, eps):
    # Matches HF LlamaRMSNorm: normalize in fp32, cast back, scale by weight.
    xf = x.astype(jnp.float32)
    var = jnp.mean(xf * xf, axis=-1, keepdims=True)
    return (xf * jax.lax.rsqrt(var + eps)).astype(x.dtype) * w


# ------------------------------- Pallas kernel --------------------------------

def _model_kernel(x_ref, bias_ref, cos_ref, sin_ref,
                  norms_ref, wqkv_ref, wo_ref, wgu_ref, wdown_ref,
                  fnorm_ref, lmhead_ref,
                  logits_ref,
                  x_scr, ctx_scr,
                  *, H, Dh, I, eps, scale):
    """One grid step == one transformer layer.  Residual resident in x_scr."""
    f32 = jnp.float32
    bf16 = jnp.bfloat16
    HD = H * Dh
    l = pl.program_id(0)

    # Load the embeddings into the resident residual scratch once.
    @pl.when(l == 0)
    def _():
        x_scr[...] = x_ref[...]

    x = x_scr[...]                                           # (N, D) bf16

    # ---------------- attention block ----------------
    h = _rmsnorm(x, norms_ref[0:1, :], eps)                  # (N, D) bf16
    # Fused [q | k | v | rot_half(q) | rot_half(k)] projection (256 lanes).
    qkv = jnp.dot(h, wqkv_ref[...], preferred_element_type=f32)   # (N, 256) f32
    q = qkv[:, 0 * HD:1 * HD]
    k = qkv[:, 1 * HD:2 * HD]
    v = qkv[:, 2 * HD:3 * HD]
    qr = qkv[:, 3 * HD:4 * HD]                               # rotate_half(q), exact
    kr = qkv[:, 4 * HD:5 * HD]                               # rotate_half(k), exact

    cos = cos_ref[...]                                       # (N, HD) f32, head-tiled
    sin = sin_ref[...]
    qh = (q * cos + qr * sin).astype(bf16)                   # full-width RoPE, f32 FMAs
    kh = (k * cos + kr * sin).astype(bf16)
    vh = v.astype(bf16)

    bias = bias_ref[...]                                     # (N, N) f32: causal+pad+batch-block

    # Batch is fused into the rows (N = B*S); cross-batch score entries are
    # killed by the bias.  Per head: one (N,Dh)x(N,Dh)^T score matmul and one
    # (N,N)x(N,Dh) PV matmul; head outputs land in the ctx scratch so the
    # output projection is a single (N,HD)@(HD,D) matmul.
    for hh in range(H):                                      # static unroll, H=4
        sl = slice(hh * Dh, (hh + 1) * Dh)
        s = jnp.einsum("qd,kd->qk", qh[:, sl], kh[:, sl],
                       preferred_element_type=f32) * scale + bias
        m = jnp.max(s, axis=-1, keepdims=True)
        p = jnp.exp(s - m)
        p = p / jnp.sum(p, axis=-1, keepdims=True)           # exact softmax (HF parity)
        pv = jnp.dot(p.astype(bf16), vh[:, sl], preferred_element_type=f32)
        ctx_scr[:, sl] = pv.astype(bf16)

    attn = jnp.dot(ctx_scr[...], wo_ref[...], preferred_element_type=f32)
    x = x + attn.astype(bf16)                                # residual add (bf16)

    # ---------------- MLP block (SwiGLU fused into gate/up epilogue) ----------
    h2 = _rmsnorm(x, norms_ref[1:2, :], eps)
    gu = jnp.dot(h2, wgu_ref[...], preferred_element_type=f32)     # (N, 2I) f32
    g = gu[:, :I]
    u = gu[:, I:2 * I]
    act = (g * jax.nn.sigmoid(g) * u).astype(bf16)           # silu(g) * u
    d = jnp.dot(act, wdown_ref[...], preferred_element_type=f32)
    x = x + d.astype(bf16)                                   # residual add (bf16)
    x_scr[...] = x                                           # carry to next layer (VMEM only)

    # ---------------- final norm + lm_head, last layer only -------------------
    @pl.when(l == pl.num_programs(0) - 1)
    def _():
        hf = _rmsnorm(x, fnorm_ref[...], eps)
        logits_ref[...] = jnp.dot(hf, lmhead_ref[...],
                                  preferred_element_type=jnp.float32)


# ------------------------------- pallas_call wrapper ---------------------------

def fused_model(x, bias, cos, sin, params, *, H, Dh, I, eps, scale):
    N, D = x.shape
    L = params["wqkv"].shape[0]
    Vp = params["lm_head"].shape[1]                          # padded to 128 lanes

    def rep(shape):
        # Whole-array block, constant index across the layer axis (DMA'd once).
        n = len(shape)
        return pl.BlockSpec(shape, lambda l, _n=n: (0,) * _n)

    def per_layer(arr):
        # (L, a, b) stacked weight: one layer's slab per grid step (streamed).
        return pl.BlockSpec((None,) + arr.shape[1:], lambda l: (l, 0, 0))

    kernel = functools.partial(_model_kernel, H=H, Dh=Dh, I=I, eps=eps, scale=scale)
    return pl.pallas_call(
        kernel,
        out_shape=jax.ShapeDtypeStruct((N, Vp), jnp.float32),
        grid=(L,),
        in_specs=[
            rep(x.shape),
            rep(bias.shape),
            rep(cos.shape),
            rep(sin.shape),
            per_layer(params["norms"]),
            per_layer(params["wqkv"]),
            per_layer(params["wo"]),
            per_layer(params["wgu"]),
            per_layer(params["wdown"]),
            rep(params["final_norm"].shape),
            rep(params["lm_head"].shape),
        ],
        out_specs=pl.BlockSpec((N, Vp), lambda l: (0, 0)),    # resident; lane-dense store
        scratch_shapes=[
            pltpu.VMEM((N, D), jnp.bfloat16),                 # residual stream
            pltpu.VMEM((N, H * Dh), jnp.bfloat16),            # attention context
        ],
        compiler_params=pltpu.CompilerParams(
            dimension_semantics=("arbitrary",)),              # layers are sequential
    )(x, bias, cos, sin,
      params["norms"], params["wqkv"], params["wo"], params["wgu"],
      params["wdown"], params["final_norm"], params["lm_head"])


# --------------------------------- host-side glue --------------------------------

def rope_cos_sin(seq_len, dim, theta, batch, n_heads):
    inv = 1.0 / (theta ** (jnp.arange(0, dim, 2, dtype=jnp.float32) / dim))
    t = jnp.arange(seq_len, dtype=jnp.float32)
    freqs = jnp.outer(t, inv)                                 # (S, dim/2)
    emb = jnp.concatenate([freqs, freqs], axis=-1)            # (S, dim)
    # Tile over batch (rows) and heads (lanes) so RoPE is full-width in-kernel.
    cos = jnp.tile(jnp.cos(emb), (batch, n_heads))            # (B*S, H*Dh)
    sin = jnp.tile(jnp.sin(emb), (batch, n_heads))
    return cos, sin


def build_attn_bias(attention_mask, seq_len):
    # (B*S, B*S) additive bias: same-batch block-diagonal AND causal AND key
    # not padded.  Finite constant (no -inf overflow / NaN on masked rows).
    B = attention_mask.shape[0]
    N = B * seq_len
    tok_b = jnp.repeat(jnp.arange(B), seq_len)                # batch id per token
    tok_p = jnp.tile(jnp.arange(seq_len), B)                  # position per token
    keep = ((tok_b[:, None] == tok_b[None, :])
            & (tok_p[:, None] >= tok_p[None, :])
            & (attention_mask.reshape(N)[None, :] > 0))
    return jnp.where(keep, 0.0, -1e30).astype(jnp.float32)


def rotate_half_cols(w, n_heads, head_dim):
    # Returns W' such that x @ W' == rotate_half(x @ W) per head (exact: pure
    # column permutation + sign flip, no arithmetic).
    D = w.shape[0]
    half = head_dim // 2
    w4 = w.reshape(D, n_heads, head_dim)
    first, second = w4[..., :half], w4[..., half:]
    return jnp.concatenate([-second, first], axis=-1).reshape(D, n_heads * head_dim)


def _pad_lanes(w, lane=LANE):
    n = w.shape[-1]
    n_pad = ((n + lane - 1) // lane) * lane
    if n_pad == n:
        return w
    return jnp.pad(w, ((0, 0), (0, n_pad - n)))


def init_params(key, cfg):
    D, V, I = cfg["hidden"], cfg["vocab"], cfg["intermediate"]
    HD = cfg["n_heads"] * cfg["head_dim"]

    def dense(k, shape, std=0.02):
        return (std * jax.random.normal(k, shape, dtype=jnp.float32)).astype(jnp.bfloat16)

    keys = jax.random.split(key, 2 + 8 * cfg["n_layers"])
    params = dict(
        embed=dense(keys[0], (V, D)),
        final_norm=jnp.ones((1, D), dtype=jnp.bfloat16),
        lm_head=dense(keys[1], (D, V)),
        layers=[],
    )
    ki = 2
    for _ in range(cfg["n_layers"]):
        params["layers"].append(dict(
            input_norm=jnp.ones((1, D), dtype=jnp.bfloat16),
            post_norm=jnp.ones((1, D), dtype=jnp.bfloat16),
            wq=dense(keys[ki + 0], (D, HD)),
            wk=dense(keys[ki + 1], (D, HD)),
            wv=dense(keys[ki + 2], (D, HD)),
            wo=dense(keys[ki + 3], (HD, D)),
            w_gate=dense(keys[ki + 4], (D, I)),
            w_up=dense(keys[ki + 5], (D, I)),
            w_down=dense(keys[ki + 6], (I, D)),
        ))
        ki += 8
    return params


def prepare_params(raw, cfg):
    # One-time weight re-packing: per-layer weights stacked along a leading
    # layer axis (streamed through the layer grid axis); rotate_half folded
    # into the QKV projection; lane padding applied host-side.
    H, Dh = cfg["n_heads"], cfg["head_dim"]
    norms, wqkv, wo, wgu, wdown = [], [], [], [], []
    for l in raw["layers"]:
        wq, wk, wv = l["wq"], l["wk"], l["wv"]
        wqkv.append(_pad_lanes(jnp.concatenate(
            [wq, wk, wv,
             rotate_half_cols(wq, H, Dh), rotate_half_cols(wk, H, Dh)], axis=1)))
        wo.append(l["wo"])
        wgu.append(jnp.concatenate([l["w_gate"], l["w_up"]], axis=1))
        wdown.append(l["w_down"])
        norms.append(jnp.concatenate([l["input_norm"], l["post_norm"]], axis=0))
    return dict(
        embed=raw["embed"],
        final_norm=raw["final_norm"],
        lm_head=_pad_lanes(raw["lm_head"]),
        norms=jnp.stack(norms),        # (L, 2, D)
        wqkv=jnp.stack(wqkv),          # (L, D, 256)
        wo=jnp.stack(wo),              # (L, HD, D)
        wgu=jnp.stack(wgu),            # (L, D, 2I)
        wdown=jnp.stack(wdown),        # (L, I, D)
    )


def llama_forward(params, input_ids, attention_mask, cfg):
    B, S = input_ids.shape
    H, Dh, D, V = cfg["n_heads"], cfg["head_dim"], cfg["hidden"], cfg["vocab"]
    I = cfg["intermediate"]
    scale = 1.0 / math.sqrt(Dh)

    # Embedding gather left to XLA (no clean Pallas gather at this size).
    x = jnp.take(params["embed"], input_ids, axis=0).reshape(B * S, D)

    cos, sin = rope_cos_sin(S, Dh, cfg["rope_theta"], B, H)   # (B*S, HD) f32
    bias = build_attn_bias(attention_mask, S)                 # (B*S, B*S) f32

    logits = fused_model(x, bias, cos, sin, params,
                         H=H, Dh=Dh, I=I, eps=cfg["rms_eps"], scale=scale)
    return logits[:, :V].reshape(B, S, V)                     # strip lane padding


# TODO(synk): tokenizer, HF checkpoint loading / device_map, KV-cache /
# generation, and the HF output container are out of scope; this reproduces the
# dense forward pass (logits) only.

if __name__ == "__main__":
    key = jax.random.PRNGKey(0)
    pkey, ikey = jax.random.split(key)

    raw_params = init_params(pkey, CFG)
    params = prepare_params(raw_params, CFG)

    B, S = 2, 8
    input_ids = jax.random.randint(ikey, (B, S), 0, CFG["vocab"], dtype=jnp.int32)
    attention_mask = jnp.array(
        [[1, 1, 1, 1, 1, 1, 1, 1],
         [1, 1, 1, 1, 1, 1, 0, 0]], dtype=jnp.int32)

    fwd = jax.jit(functools.partial(llama_forward, cfg=CFG))
    logits = fwd(params, input_ids, attention_mask)
    logits = jax.block_until_ready(logits)

    assert logits.shape == (B, S, CFG["vocab"]) and logits.dtype == jnp.float32
    assert bool(jnp.all(jnp.isfinite(logits)))
    print("KERNEL_OK")
</pallas_src>

<mosaic_0001>
module attributes {stable_mosaic.version = 11 : i64} {
  func.func @_model_kernel(%arg0: i32, %arg1: memref<16x32xbf16, #tpu.memory_space<vmem>>, %arg2: memref<16x16xf32, #tpu.memory_space<vmem>>, %arg3: memref<16x32xf32, #tpu.memory_space<vmem>>, %arg4: memref<16x32xf32, #tpu.memory_space<vmem>>, %arg5: memref<1x2x32xbf16, #tpu.memory_space<vmem>>, %arg6: memref<1x32x256xbf16, #tpu.memory_space<vmem>>, %arg7: memref<1x32x32xbf16, #tpu.memory_space<vmem>>, %arg8: memref<1x32x128xbf16, #tpu.memory_space<vmem>>, %arg9: memref<1x64x32xbf16, #tpu.memory_space<vmem>>, %arg10: memref<1x32xbf16, #tpu.memory_space<vmem>>, %arg11: memref<32x128xbf16, #tpu.memory_space<vmem>>, %arg12: memref<16x128xf32, #tpu.memory_space<vmem>>, %arg13: memref<16x32xbf16, #tpu.memory_space<vmem>>, %arg14: memref<16x32xbf16, #tpu.memory_space<vmem>>) attributes {dimension_semantics = [#tpu.dimension_semantics<arbitrary>], iteration_bounds = array<i64: 2>, scalar_prefetch = 0 : i64, scratch_operands = 2 : i64, tpu.core_type = #tpu.core_type<tc>, window_params = [{pipeline_mode = #tpu.pipeline_mode<synchronous>, transform_indices = @transform_0, window_bounds = array<i64: 16, 32>}, {pipeline_mode = #tpu.pipeline_mode<synchronous>, transform_indices = @transform_1, window_bounds = array<i64: 16, 16>}, {pipeline_mode = #tpu.pipeline_mode<synchronous>, transform_indices = @transform_2, window_bounds = array<i64: 16, 32>}, {pipeline_mode = #tpu.pipeline_mode<synchronous>, transform_indices = @transform_3, window_bounds = array<i64: 16, 32>}, {transform_indices = @transform_4, window_bounds = array<i64: 1, 2, 32>}, {transform_indices = @transform_5, window_bounds = array<i64: 1, 32, 256>}, {transform_indices = @transform_6, window_bounds = array<i64: 1, 32, 32>}, {transform_indices = @transform_7, window_bounds = array<i64: 1, 32, 128>}, {transform_indices = @transform_8, window_bounds = array<i64: 1, 64, 32>}, {pipeline_mode = #tpu.pipeline_mode<synchronous>, transform_indices = @transform_9, window_bounds = array<i64: 1, 32>}, {pipeline_mode = #tpu.pipeline_mode<synchronous>, transform_indices = @transform_10, window_bounds = array<i64: 32, 128>}, {pipeline_mode = #tpu.pipeline_mode<synchronous>, transform_indices = @transform_11, window_bounds = array<i64: 16, 128>}]} {
    %c0_i32 = arith.constant 0 : i32
    %0 = arith.cmpi eq, %arg0, %c0_i32 : i32
    %1 = arith.extui %0 : i1 to i32
    %c0_i32_0 = arith.constant 0 : i32
    %2 = arith.cmpi ne, %1, %c0_i32_0 : i32
    scf.if %2 {
      %c0_65 = arith.constant 0 : index
      %c0_66 = arith.constant 0 : index
      %164 = vector.load %arg1[%c0_65, %c0_66] : memref<16x32xbf16, #tpu.memory_space<vmem>>, vector<16x32xbf16>
      %c0_67 = arith.constant 0 : index
      %c0_68 = arith.constant 0 : index
      %165 = vector.load %arg13[%c0_67, %c0_68] : memref<16x32xbf16, #tpu.memory_space<vmem>>, vector<16x32xbf16>
      tpu.vector_store %arg13[%c0_67, %c0_68], %164 {strides = array<i32>} : memref<16x32xbf16, #tpu.memory_space<vmem>>, vector<16x32xbf16>,
    } else {
    }
    %c0 = arith.constant 0 : index
    %c0_1 = arith.constant 0 : index
    %3 = vector.load %arg13[%c0, %c0_1] : memref<16x32xbf16, #tpu.memory_space<vmem>>, vector<16x32xbf16>
    %c0_2 = arith.constant 0 : index
    %c0_3 = arith.constant 0 : index
    %c0_4 = arith.constant 0 : index
    %4 = vector.load %arg5[%c0_2, %c0_3, %c0_4] : memref<1x2x32xbf16, #tpu.memory_space<vmem>>, vector<1x1x32xbf16>
    %5 = vector.shape_cast %4 : vector<1x1x32xbf16> to vector<1x32xbf16>
    %6 = arith.extf %3 : vector<16x32xbf16> to vector<16x32xf32>
    %7 = arith.mulf %6, %6 : vector<16x32xf32>
    %cst = arith.constant dense<0.000000e+00> : vector<16xf32>
    %8 = vector.multi_reduction <add>, %7, %cst [1] : vector<16x32xf32> to vector<16xf32>
    %9 = vector.shape_cast %8 : vector<16xf32> to vector<16x1xf32>
    %cst_5 = arith.constant 3.200000e+01 : f32
    %10 = vector.broadcast %cst_5 : f32 to vector<16x1xf32>
    %11 = arith.divf %9, %10 : vector<16x1xf32>
    %cst_6 = arith.constant 9.99999997E-7 : f32
    %12 = vector.broadcast %cst_6 : f32 to vector<16x1xf32>
    %13 = arith.addf %11, %12 : vector<16x1xf32>
    %14 = math.rsqrt %13 : vector<16x1xf32>
    %15 = vector.broadcast %14 : vector<16x1xf32> to vector<16x32xf32>
    %16 = arith.mulf %6, %15 : vector<16x32xf32>
    %17 = arith.truncf %16 : vector<16x32xf32> to vector<16x32xbf16>
    %18 = vector.broadcast %5 : vector<1x32xbf16> to vector<16x32xbf16>
    %19 = arith.mulf %17, %18 : vector<16x32xbf16>
    %c0_7 = arith.constant 0 : index
    %c0_8 = arith.constant 0 : index
    %c0_9 = arith.constant 0 : index
    %20 = vector.load %arg6[%c0_7, %c0_8, %c0_9] : memref<1x32x256xbf16, #tpu.memory_space<vmem>>, vector<1x32x256xbf16>
    %21 = vector.shape_cast %20 : vector<1x32x256xbf16> to vector<32x256xbf16>
    %cst_10 = arith.constant dense<0.000000e+00> : vector<16x256xf32>
    %22 = tpu.matmul %19, %21, %cst_10 {dimension_numbers = #tpu.dot_dimension_numbers<[1], [0], [0], [1], [0, 0, 1, 1], [], []>} : vector<16x32xbf16>, vector<32x256xbf16>, vector<16x256xf32> -> vector<16x256xf32>
    %23 = vector.extract_strided_slice %22 {offsets = [0, 0], sizes = [16, 32], strides = [1, 1]} : vector<16x256xf32> to vector<16x32xf32>
    %24 = vector.extract_strided_slice %22 {offsets = [0, 32], sizes = [16, 32], strides = [1, 1]} : vector<16x256xf32> to vector<16x32xf32>
    %25 = vector.extract_strided_slice %22 {offsets = [0, 64], sizes = [16, 32], strides = [1, 1]} : vector<16x256xf32> to vector<16x32xf32>
    %26 = vector.extract_strided_slice %22 {offsets = [0, 96], sizes = [16, 32], strides = [1, 1]} : vector<16x256xf32> to vector<16x32xf32>
    %27 = vector.extract_strided_slice %22 {offsets = [0, 128], sizes = [16, 32], strides = [1, 1]} : vector<16x256xf32> to vector<16x32xf32>
    %c0_11 = arith.constant 0 : index
    %c0_12 = arith.constant 0 : index
    %28 = vector.load %arg3[%c0_11, %c0_12] : memref<16x32xf32, #tpu.memory_space<vmem>>, vector<16x32xf32>
    %c0_13 = arith.constant 0 : index
    %c0_14 = arith.constant 0 : index
    %29 = vector.load %arg4[%c0_13, %c0_14] : memref<16x32xf32, #tpu.memory_space<vmem>>, vector<16x32xf32>
    %30 = arith.mulf %23, %28 : vector<16x32xf32>
    %31 = arith.mulf %26, %29 : vector<16x32xf32>
    %32 = arith.addf %30, %31 : vector<16x32xf32>
    %33 = arith.truncf %32 : vector<16x32xf32> to vector<16x32xbf16>
    %34 = arith.mulf %24, %28 : vector<16x32xf32>
    %35 = arith.mulf %27, %29 : vector<16x32xf32>
    %36 = arith.addf %34, %35 : vector<16x32xf32>
    %37 = arith.truncf %36 : vector<16x32xf32> to vector<16x32xbf16>
    %38 = arith.truncf %25 : vector<16x32xf32> to vector<16x32xbf16>
    %c0_15 = arith.constant 0 : index
    %c0_16 = arith.constant 0 : index
    %39 = vector.load %arg2[%c0_15, %c0_16] : memref<16x16xf32, #tpu.memory_space<vmem>>, vector<16x16xf32>
    %40 = vector.extract_strided_slice %33 {offsets = [0, 0], sizes = [16, 8], strides = [1, 1]} : vector<16x32xbf16> to vector<16x8xbf16>
    %41 = vector.extract_strided_slice %37 {offsets = [0, 0], sizes = [16, 8], strides = [1, 1]} : vector<16x32xbf16> to vector<16x8xbf16>
    "tpu.trace_start"() <{level = 10 : i32, message = "qd,kd->qk"}> : () -> ()
    %cst_17 = arith.constant dense<0.000000e+00> : vector<16x16xf32>
    %42 = tpu.matmul %40, %41, %cst_17 {dimension_numbers = #tpu.dot_dimension_numbers<[1], [1], [0], [0], [0, 0, 1, 0], [], []>} : vector<16x8xbf16>, vector<16x8xbf16>, vector<16x16xf32> -> vector<16x16xf32>
    "tpu.trace_stop"() : () -> ()
    %cst_18 = arith.constant 0.353553385 : f32
    %43 = vector.broadcast %cst_18 : f32 to vector<16x16xf32>
    %44 = arith.mulf %42, %43 : vector<16x16xf32>
    %45 = arith.addf %44, %39 : vector<16x16xf32>
    %cst_19 = arith.constant dense<0xFF800000> : vector<16xf32>
    %46 = vector.multi_reduction <maximumf>, %45, %cst_19 [1] : vector<16x16xf32> to vector<16xf32>
    %47 = vector.shape_cast %46 : vector<16xf32> to vector<16x1xf32>
    %48 = vector.broadcast %47 : vector<16x1xf32> to vector<16x16xf32>
    %49 = arith.subf %45, %48 : vector<16x16xf32>
    %50 = math.exp %49 : vector<16x16xf32>
    %cst_20 = arith.constant dense<0.000000e+00> : vector<16xf32>
    %51 = vector.multi_reduction <add>, %50, %cst_20 [1] : vector<16x16xf32> to vector<16xf32>
    %52 = vector.shape_cast %51 : vector<16xf32> to vector<16x1xf32>
    %53 = vector.broadcast %52 : vector<16x1xf32> to vector<16x16xf32>
    %54 = arith.divf %50, %53 : vector<16x16xf32>
    %55 = arith.truncf %54 : vector<16x16xf32> to vector<16x16xbf16>
    %56 = vector.extract_strided_slice %38 {offsets = [0, 0], sizes = [16, 8], strides = [1, 1]} : vector<16x32xbf16> to vector<16x8xbf16>
    %cst_21 = arith.constant dense<0.000000e+00> : vector<16x8xf32>
    %57 = tpu.matmul %55, %56, %cst_21 {dimension_numbers = #tpu.dot_dimension_numbers<[1], [0], [0], [1], [0, 0, 1, 1], [], []>} : vector<16x16xbf16>, vector<16x8xbf16>, vector<16x8xf32> -> vector<16x8xf32>
    %58 = arith.truncf %57 : vector<16x8xf32> to vector<16x8xbf16>
    %c0_22 = arith.constant 0 : index
    %c0_23 = arith.constant 0 : index
    %59 = vector.load %arg14[%c0_22, %c0_23] : memref<16x32xbf16, #tpu.memory_space<vmem>>, vector<16x8xbf16>
    tpu.vector_store %arg14[%c0_22, %c0_23], %58 {strides = array<i32>} : memref<16x32xbf16, #tpu.memory_space<vmem>>, vector<16x8xbf16>,
    %60 = vector.extract_strided_slice %33 {offsets = [0, 8], sizes = [16, 8], strides = [1, 1]} : vector<16x32xbf16> to vector<16x8xbf16>
    %61 = vector.extract_strided_slice %37 {offsets = [0, 8], sizes = [16, 8], strides = [1, 1]} : vector<16x32xbf16> to vector<16x8xbf16>
    "tpu.trace_start"() <{level = 10 : i32, message = "qd,kd->qk"}> : () -> ()
    %cst_24 = arith.constant dense<0.000000e+00> : vector<16x16xf32>
    %62 = tpu.matmul %60, %61, %cst_24 {dimension_numbers = #tpu.dot_dimension_numbers<[1], [1], [0], [0], [0, 0, 1, 0], [], []>} : vector<16x8xbf16>, vector<16x8xbf16>, vector<16x16xf32> -> vector<16x16xf32>
    "tpu.trace_stop"() : () -> ()
    %cst_25 = arith.constant 0.353553385 : f32
    %63 = vector.broadcast %cst_25 : f32 to vector<16x16xf32>
    %64 = arith.mulf %62, %63 : vector<16x16xf32>
    %65 = arith.addf %64, %39 : vector<16x16xf32>
    %cst_26 = arith.constant dense<0xFF800000> : vector<16xf32>
    %66 = vector.multi_reduction <maximumf>, %65, %cst_26 [1] : vector<16x16xf32> to vector<16xf32>
    %67 = vector.shape_cast %66 : vector<16xf32> to vector<16x1xf32>
    %68 = vector.broadcast %67 : vector<16x1xf32> to vector<16x16xf32>
    %69 = arith.subf %65, %68 : vector<16x16xf32>
    %70 = math.exp %69 : vector<16x16xf32>
    %cst_27 = arith.constant dense<0.000000e+00> : vector<16xf32>
    %71 = vector.multi_reduction <add>, %70, %cst_27 [1] : vector<16x16xf32> to vector<16xf32>
    %72 = vector.shape_cast %71 : vector<16xf32> to vector<16x1xf32>
    %73 = vector.broadcast %72 : vector<16x1xf32> to vector<16x16xf32>
    %74 = arith.divf %70, %73 : vector<16x16xf32>
    %75 = arith.truncf %74 : vector<16x16xf32> to vector<16x16xbf16>
    %76 = vector.extract_strided_slice %38 {offsets = [0, 8], sizes = [16, 8], strides = [1, 1]} : vector<16x32xbf16> to vector<16x8xbf16>
    %cst_28 = arith.constant dense<0.000000e+00> : vector<16x8xf32>
    %77 = tpu.matmul %75, %76, %cst_28 {dimension_numbers = #tpu.dot_dimension_numbers<[1], [0], [0], [1], [0, 0, 1, 1], [], []>} : vector<16x16xbf16>, vector<16x8xbf16>, vector<16x8xf32> -> vector<16x8xf32>
    %78 = arith.truncf %77 : vector<16x8xf32> to vector<16x8xbf16>
    %c0_29 = arith.constant 0 : index
    %c8 = arith.constant 8 : index
    %79 = vector.load %arg14[%c0_29, %c8] : memref<16x32xbf16, #tpu.memory_space<vmem>>, vector<16x8xbf16>
    tpu.vector_store %arg14[%c0_29, %c8], %78 {strides = array<i32>} : memref<16x32xbf16, #tpu.memory_space<vmem>>, vector<16x8xbf16>,
    %80 = vector.extract_strided_slice %33 {offsets = [0, 16], sizes = [16, 8], strides = [1, 1]} : vector<16x32xbf16> to vector<16x8xbf16>
    %81 = vector.extract_strided_slice %37 {offsets = [0, 16], sizes = [16, 8], strides = [1, 1]} : vector<16x32xbf16> to vector<16x8xbf16>
    "tpu.trace_start"() <{level = 10 : i32, message = "qd,kd->qk"}> : () -> ()
    %cst_30 = arith.constant dense<0.000000e+00> : vector<16x16xf32>
    %82 = tpu.matmul %80, %81, %cst_30 {dimension_numbers = #tpu.dot_dimension_numbers<[1], [1], [0], [0], [0, 0, 1, 0], [], []>} : vector<16x8xbf16>, vector<16x8xbf16>, vector<16x16xf32> -> vector<16x16xf32>
    "tpu.trace_stop"() : () -> ()
    %cst_31 = arith.constant 0.353553385 : f32
    %83 = vector.broadcast %cst_31 : f32 to vector<16x16xf32>
    %84 = arith.mulf %82, %83 : vector<16x16xf32>
    %85 = arith.addf %84, %39 : vector<16x16xf32>
    %cst_32 = arith.constant dense<0xFF800000> : vector<16xf32>
    %86 = vector.multi_reduction <maximumf>, %85, %cst_32 [1] : vector<16x16xf32> to vector<16xf32>
    %87 = vector.shape_cast %86 : vector<16xf32> to vector<16x1xf32>
    %88 = vector.broadcast %87 : vector<16x1xf32> to vector<16x16xf32>
    %89 = arith.subf %85, %88 : vector<16x16xf32>
    %90 = math.exp %89 : vector<16x16xf32>
    %cst_33 = arith.constant dense<0.000000e+00> : vector<16xf32>
    %91 = vector.multi_reduction <add>, %90, %cst_33 [1] : vector<16x16xf32> to vector<16xf32>
    %92 = vector.shape_cast %91 : vector<16xf32> to vector<16x1xf32>
    %93 = vector.broadcast %92 : vector<16x1xf32> to vector<16x16xf32>
    %94 = arith.divf %90, %93 : vector<16x16xf32>
    %95 = arith.truncf %94 : vector<16x16xf32> to vector<16x16xbf16>
    %96 = vector.extract_strided_slice %38 {offsets = [0, 16], sizes = [16, 8], strides = [1, 1]} : vector<16x32xbf16> to vector<16x8xbf16>
    %cst_34 = arith.constant dense<0.000000e+00> : vector<16x8xf32>
    %97 = tpu.matmul %95, %96, %cst_34 {dimension_numbers = #tpu.dot_dimension_numbers<[1], [0], [0], [1], [0, 0, 1, 1], [], []>} : vector<16x16xbf16>, vector<16x8xbf16>, vector<16x8xf32> -> vector<16x8xf32>
    %98 = arith.truncf %97 : vector<16x8xf32> to vector<16x8xbf16>
    %c0_35 = arith.constant 0 : index
    %c16 = arith.constant 16 : index
    %99 = vector.load %arg14[%c0_35, %c16] : memref<16x32xbf16, #tpu.memory_space<vmem>>, vector<16x8xbf16>
    tpu.vector_store %arg14[%c0_35, %c16], %98 {strides = array<i32>} : memref<16x32xbf16, #tpu.memory_space<vmem>>, vector<16x8xbf16>,
    %100 = vector.extract_strided_slice %33 {offsets = [0, 24], sizes = [16, 8], strides = [1, 1]} : vector<16x32xbf16> to vector<16x8xbf16>
    %101 = vector.extract_strided_slice %37 {offsets = [0, 24], sizes = [16, 8], strides = [1, 1]} : vector<16x32xbf16> to vector<16x8xbf16>
    "tpu.trace_start"() <{level = 10 : i32, message = "qd,kd->qk"}> : () -> ()
    %cst_36 = arith.constant dense<0.000000e+00> : vector<16x16xf32>
    %102 = tpu.matmul %100, %101, %cst_36 {dimension_numbers = #tpu.dot_dimension_numbers<[1], [1], [0], [0], [0, 0, 1, 0], [], []>} : vector<16x8xbf16>, vector<16x8xbf16>, vector<16x16xf32> -> vector<16x16xf32>
    "tpu.trace_stop"() : () -> ()
    %cst_37 = arith.constant 0.353553385 : f32
    %103 = vector.broadcast %cst_37 : f32 to vector<16x16xf32>
    %104 = arith.mulf %102, %103 : vector<16x16xf32>
    %105 = arith.addf %104, %39 : vector<16x16xf32>
    %cst_38 = arith.constant dense<0xFF800000> : vector<16xf32>
    %106 = vector.multi_reduction <maximumf>, %105, %cst_38 [1] : vector<16x16xf32> to vector<16xf32>
    %107 = vector.shape_cast %106 : vector<16xf32> to vector<16x1xf32>
    %108 = vector.broadcast %107 : vector<16x1xf32> to vector<16x16xf32>
    %109 = arith.subf %105, %108 : vector<16x16xf32>
    %110 = math.exp %109 : vector<16x16xf32>
    %cst_39 = arith.constant dense<0.000000e+00> : vector<16xf32>
    %111 = vector.multi_reduction <add>, %110, %cst_39 [1] : vector<16x16xf32> to vector<16xf32>
    %112 = vector.shape_cast %111 : vector<16xf32> to vector<16x1xf32>
    %113 = vector.broadcast %112 : vector<16x1xf32> to vector<16x16xf32>
    %114 = arith.divf %110, %113 : vector<16x16xf32>
    %115 = arith.truncf %114 : vector<16x16xf32> to vector<16x16xbf16>
    %116 = vector.extract_strided_slice %38 {offsets = [0, 24], sizes = [16, 8], strides = [1, 1]} : vector<16x32xbf16> to vector<16x8xbf16>
    %cst_40 = arith.constant dense<0.000000e+00> : vector<16x8xf32>
    %117 = tpu.matmul %115, %116, %cst_40 {dimension_numbers = #tpu.dot_dimension_numbers<[1], [0], [0], [1], [0, 0, 1, 1], [], []>} : vector<16x16xbf16>, vector<16x8xbf16>, vector<16x8xf32> -> vector<16x8xf32>
    %118 = arith.truncf %117 : vector<16x8xf32> to vector<16x8xbf16>
    %c0_41 = arith.constant 0 : index
    %c24 = arith.constant 24 : index
    %119 = vector.load %arg14[%c0_41, %c24] : memref<16x32xbf16, #tpu.memory_space<vmem>>, vector<16x8xbf16>
    tpu.vector_store %arg14[%c0_41, %c24], %118 {strides = array<i32>} : memref<16x32xbf16, #tpu.memory_space<vmem>>, vector<16x8xbf16>,
    %c0_42 = arith.constant 0 : index
    %c0_43 = arith.constant 0 : index
    %120 = vector.load %arg14[%c0_42, %c0_43] : memref<16x32xbf16, #tpu.memory_space<vmem>>, vector<16x32xbf16>
    %c0_44 = arith.constant 0 : index
    %c0_45 = arith.constant 0 : index
    %c0_46 = arith.constant 0 : index
    %121 = vector.load %arg7[%c0_44, %c0_45, %c0_46] : memref<1x32x32xbf16, #tpu.memory_space<vmem>>, vector<1x32x32xbf16>
    %122 = vector.shape_cast %121 : vector<1x32x32xbf16> to vector<32x32xbf16>
    %cst_47 = arith.constant dense<0.000000e+00> : vector<16x32xf32>
    %123 = tpu.matmul %120, %122, %cst_47 {dimension_numbers = #tpu.dot_dimension_numbers<[1], [0], [0], [1], [0, 0, 1, 1], [], []>} : vector<16x32xbf16>, vector<32x32xbf16>, vector<16x32xf32> -> vector<16x32xf32>
    %124 = arith.truncf %123 : vector<16x32xf32> to vector<16x32xbf16>
    %125 = arith.addf %3, %124 : vector<16x32xbf16>
    %c0_48 = arith.constant 0 : index
    %c1 = arith.constant 1 : index
    %c0_49 = arith.constant 0 : index
    %126 = vector.load %arg5[%c0_48, %c1, %c0_49] : memref<1x2x32xbf16, #tpu.memory_space<vmem>>, vector<1x1x32xbf16>
    %127 = vector.shape_cast %126 : vector<1x1x32xbf16> to vector<1x32xbf16>
    %128 = arith.extf %125 : vector<16x32xbf16> to vector<16x32xf32>
    %129 = arith.mulf %128, %128 : vector<16x32xf32>
    %cst_50 = arith.constant dense<0.000000e+00> : vector<16xf32>
    %130 = vector.multi_reduction <add>, %129, %cst_50 [1] : vector<16x32xf32> to vector<16xf32>
    %131 = vector.shape_cast %130 : vector<16xf32> to vector<16x1xf32>
    %cst_51 = arith.constant 3.200000e+01 : f32
    %132 = vector.broadcast %cst_51 : f32 to vector<16x1xf32>
    %133 = arith.divf %131, %132 : vector<16x1xf32>
    %cst_52 = arith.constant 9.99999997E-7 : f32
    %134 = vector.broadcast %cst_52 : f32 to vector<16x1xf32>
    %135 = arith.addf %133, %134 : vector<16x1xf32>
    %136 = math.rsqrt %135 : vector<16x1xf32>
    %137 = vector.broadcast %136 : vector<16x1xf32> to vector<16x32xf32>
    %138 = arith.mulf %128, %137 : vector<16x32xf32>
    %139 = arith.truncf %138 : vector<16x32xf32> to vector<16x32xbf16>
    %140 = vector.broadcast %127 : vector<1x32xbf16> to vector<16x32xbf16>
    %141 = arith.mulf %139, %140 : vector<16x32xbf16>
    %c0_53 = arith.constant 0 : index
    %c0_54 = arith.constant 0 : index
    %c0_55 = arith.constant 0 : index
    %142 = vector.load %arg8[%c0_53, %c0_54, %c0_55] : memref<1x32x128xbf16, #tpu.memory_space<vmem>>, vector<1x32x128xbf16>
    %143 = vector.shape_cast %142 : vector<1x32x128xbf16> to vector<32x128xbf16>
    %cst_56 = arith.constant dense<0.000000e+00> : vector<16x128xf32>
    %144 = tpu.matmul %141, %143, %cst_56 {dimension_numbers = #tpu.dot_dimension_numbers<[1], [0], [0], [1], [0, 0, 1, 1], [], []>} : vector<16x32xbf16>, vector<32x128xbf16>, vector<16x128xf32> -> vector<16x128xf32>
    %145 = vector.extract_strided_slice %144 {offsets = [0, 0], sizes = [16, 64], strides = [1, 1]} : vector<16x128xf32> to vector<16x64xf32>
    %146 = vector.extract_strided_slice %144 {offsets = [0, 64], sizes = [16, 64], strides = [1, 1]} : vector<16x128xf32> to vector<16x64xf32>
    %147 = arith.negf %145 : vector<16x64xf32>
    %148 = math.exp %147 : vector<16x64xf32>
    %cst_57 = arith.constant 1.000000e+00 : f32
    %149 = vector.broadcast %cst_57 : f32 to vector<16x64xf32>
    %150 = arith.addf %149, %148 : vector<16x64xf32>
    %151 = arith.divf %149, %150 : vector<16x64xf32>
    %152 = arith.mulf %145, %151 : vector<16x64xf32>
    %153 = arith.mulf %152, %146 : vector<16x64xf32>
    %154 = arith.truncf %153 : vector<16x64xf32> to vector<16x64xbf16>
    %c0_58 = arith.constant 0 : index
    %c0_59 = arith.constant 0 : index
    %c0_60 = arith.constant 0 : index
    %155 = vector.load %arg9[%c0_58, %c0_59, %c0_60] : memref<1x64x32xbf16, #tpu.memory_space<vmem>>, vector<1x64x32xbf16>
    %156 = vector.shape_cast %155 : vector<1x64x32xbf16> to vector<64x32xbf16>
    %cst_61 = arith.constant dense<0.000000e+00> : vector<16x32xf32>
    %157 = tpu.matmul %154, %156, %cst_61 {dimension_numbers = #tpu.dot_dimension_numbers<[1], [0], [0], [1], [0, 0, 1, 1], [], []>} : vector<16x64xbf16>, vector<64x32xbf16>, vector<16x32xf32> -> vector<16x32xf32>
    %158 = arith.truncf %157 : vector<16x32xf32> to vector<16x32xbf16>
    %159 = arith.addf %125, %158 : vector<16x32xbf16>
    %c0_62 = arith.constant 0 : index
    %c0_63 = arith.constant 0 : index
    %160 = vector.load %arg13[%c0_62, %c0_63] : memref<16x32xbf16, #tpu.memory_space<vmem>>, vector<16x32xbf16>
    tpu.vector_store %arg13[%c0_62, %c0_63], %159 {strides = array<i32>} : memref<16x32xbf16, #tpu.memory_space<vmem>>, vector<16x32xbf16>,
    %c1_i32 = arith.constant 1 : i32
    %161 = arith.cmpi eq, %arg0, %c1_i32 : i32
    %162 = arith.extui %161 : i1 to i32
    %c0_i32_64 = arith.constant 0 : i32
    %163 = arith.cmpi ne, %162, %c0_i32_64 : i32
    scf.if %163 {
      %c0_65 = arith.constant 0 : index
      %c0_66 = arith.constant 0 : index
      %164 = vector.load %arg10[%c0_65, %c0_66] : memref<1x32xbf16, #tpu.memory_space<vmem>>, vector<1x32xbf16>
      %165 = arith.extf %159 : vector<16x32xbf16> to vector<16x32xf32>
      %166 = arith.mulf %165, %165 : vector<16x32xf32>
      %cst_67 = arith.constant dense<0.000000e+00> : vector<16xf32>
      %167 = vector.multi_reduction <add>, %166, %cst_67 [1] : vector<16x32xf32> to vector<16xf32>
      %168 = vector.shape_cast %167 : vector<16xf32> to vector<16x1xf32>
      %cst_68 = arith.constant 3.200000e+01 : f32
      %169 = vector.broadcast %cst_68 : f32 to vector<16x1xf32>
      %170 = arith.divf %168, %169 : vector<16x1xf32>
      %cst_69 = arith.constant 9.99999997E-7 : f32
      %171 = vector.broadcast %cst_69 : f32 to vector<16x1xf32>
      %172 = arith.addf %170, %171 : vector<16x1xf32>
      %173 = math.rsqrt %172 : vector<16x1xf32>
      %174 = vector.broadcast %173 : vector<16x1xf32> to vector<16x32xf32>
      %175 = arith.mulf %165, %174 : vector<16x32xf32>
      %176 = arith.truncf %175 : vector<16x32xf32> to vector<16x32xbf16>
      %177 = vector.broadcast %164 : vector<1x32xbf16> to vector<16x32xbf16>
      %178 = arith.mulf %176, %177 : vector<16x32xbf16>
      %c0_70 = arith.constant 0 : index
      %c0_71 = arith.constant 0 : index
      %179 = vector.load %arg11[%c0_70, %c0_71] : memref<32x128xbf16, #tpu.memory_space<vmem>>, vector<32x128xbf16>
      %cst_72 = arith.constant dense<0.000000e+00> : vector<16x128xf32>
      %180 = tpu.matmul %178, %179, %cst_72 {dimension_numbers = #tpu.dot_dimension_numbers<[1], [0], [0], [1], [0, 0, 1, 1], [], []>} : vector<16x32xbf16>, vector<32x128xbf16>, vector<16x128xf32> -> vector<16x128xf32>
      %c0_73 = arith.constant 0 : index
      %c0_74 = arith.constant 0 : index
      %181 = vector.load %arg12[%c0_73, %c0_74] : memref<16x128xf32, #tpu.memory_space<vmem>>, vector<16x128xf32>
      tpu.vector_store %arg12[%c0_73, %c0_74], %180 {strides = array<i32>} : memref<16x128xf32, #tpu.memory_space<vmem>>, vector<16x128xf32>,
    } else {
    }
    return
  }
  func.func @transform_0(%arg0: i32) -> (i32, i32) {
    %c0_i32 = arith.constant 0 : i32
    %c0_i32_0 = arith.constant 0 : i32
    %c0_i32_1 = arith.constant 0 : i32
    return %c0_i32, %c0_i32_0 : i32, i32
  }
  func.func @transform_1(%arg0: i32) -> (i32, i32) {
    %c0_i32 = arith.constant 0 : i32
    %c0_i32_0 = arith.constant 0 : i32
    %c0_i32_1 = arith.constant 0 : i32
    return %c0_i32, %c0_i32_0 : i32, i32
  }
  func.func @transform_2(%arg0: i32) -> (i32, i32) {
    %c0_i32 = arith.constant 0 : i32
    %c0_i32_0 = arith.constant 0 : i32
    %c0_i32_1 = arith.constant 0 : i32
    return %c0_i32, %c0_i32_0 : i32, i32
  }
  func.func @transform_3(%arg0: i32) -> (i32, i32) {
    %c0_i32 = arith.constant 0 : i32
    %c0_i32_0 = arith.constant 0 : i32
    %c0_i32_1 = arith.constant 0 : i32
    return %c0_i32, %c0_i32_0 : i32, i32
  }
  func.func @transform_4(%arg0: i32) -> (i32, i32, i32) {
    %c0_i32 = arith.constant 0 : i32
    %c0_i32_0 = arith.constant 0 : i32
    %c0_i32_1 = arith.constant 0 : i32
    return %arg0, %c0_i32, %c0_i32_0 : i32, i32, i32
  }
  func.func @transform_5(%arg0: i32) -> (i32, i32, i32) {
    %c0_i32 = arith.constant 0 : i32
    %c0_i32_0 = arith.constant 0 : i32
    %c0_i32_1 = arith.constant 0 : i32
    return %arg0, %c0_i32, %c0_i32_0 : i32, i32, i32
  }
  func.func @transform_6(%arg0: i32) -> (i32, i32, i32) {
    %c0_i32 = arith.constant 0 : i32
    %c0_i32_0 = arith.constant 0 : i32
    %c0_i32_1 = arith.constant 0 : i32
    return %arg0, %c0_i32, %c0_i32_0 : i32, i32, i32
  }
  func.func @transform_7(%arg0: i32) -> (i32, i32, i32) {
    %c0_i32 = arith.constant 0 : i32
    %c0_i32_0 = arith.constant 0 : i32
    %c0_i32_1 = arith.constant 0 : i32
    return %arg0, %c0_i32, %c0_i32_0 : i32, i32, i32
  }
  func.func @transform_8(%arg0: i32) -> (i32, i32, i32) {
    %c0_i32 = arith.constant 0 : i32
    %c0_i32_0 = arith.constant 0 : i32
    %c0_i32_1 = arith.constant 0 : i32
    return %arg0, %c0_i32, %c0_i32_0 : i32, i32, i32
  }
  func.func @transform_9(%arg0: i32) -> (i32, i32) {
    %c0_i32 = arith.constant 0 : i32
    %c0_i32_0 = arith.constant 0 : i32
    %c0_i32_1 = arith.constant 0 : i32
    return %c0_i32, %c0_i32_0 : i32, i32
  }
  func.func @transform_10(%arg0: i32) -> (i32, i32) {
    %c0_i32 = arith.constant 0 : i32
    %c0_i32_0 = arith.constant 0 : i32
    %c0_i32_1 = arith.constant 0 : i32
    return %c0_i32, %c0_i32_0 : i32, i32
  }
  func.func @transform_11(%arg0: i32) -> (i32, i32) {
    %c0_i32 = arith.constant 0 : i32
    %c0_i32_0 = arith.constant 0 : i32
    %c0_i32_1 = arith.constant 0 : i32
    return %c0_i32, %c0_i32_0 : i32, i32
  }
}

</mosaic_0001>

<bundles_post_ra>
// kernel: tile.24
= control target key start
LH: loop header
LB: loop body
LE: loop exit
PB: predicated region body
PF: predicated region fallthrough
CT: control target
= control target key end

     0   :  { %s154_s0 = inlined_call_operand.vmem [shape: f32[8,8], index: 0, kind: input, shape index: {}]   ;;  %s155_s1 = inlined_call_operand.vmem [shape: f32[2,8,4,8], index: 1, kind: output, shape index: {}]  }
   0x1   :  { %v4_v0 = vld [vmem:[%s154_s0] ss:$0 sm:$0xff]  ;;  %v51_v1 = vld [vmem:[%s154_s0 + $0x1] ss:$0 sm:$0xff]  ;;  %v54_v2 = vld [vmem:[%s154_s0 + $0x2] ss:$0 sm:$0xff] }
   0x2   :  { %5 = vst [vmem:[%s155_s1] sm:$0xf] %v4_v0  ;;  %v57_v3 = vld [vmem:[%s154_s0 + $0x3] ss:$0 sm:$0xff]  ;;  %v60_v4 = vld [vmem:[%s154_s0 + $0x4] ss:$0 sm:$0xff] }
   0x3   :  { %50 = vst [vmem:[%s155_s1 + $0x20] sm:$0xf] %v4_v0  ;;  %v63_v5 = vld [vmem:[%s154_s0 + $0x5] ss:$0 sm:$0xff]  ;;  %v66_v6 = vld [vmem:[%s154_s0 + $0x6] ss:$0 sm:$0xff] }
   0x4   :  { %52 = vst [vmem:[%s155_s1 + $0x4] sm:$0xf] %v51_v1  ;;  %v69_v7 = vld [vmem:[%s154_s0 + $0x7] ss:$0 sm:$0xff] }
   0x5   :  { %53 = vst [vmem:[%s155_s1 + $0x24] sm:$0xf] %v51_v1 }
   0x6   :  { %55 = vst [vmem:[%s155_s1 + $0x8] sm:$0xf] %v54_v2 }
   0x7   :  { %56 = vst [vmem:[%s155_s1 + $0x28] sm:$0xf] %v54_v2 }
   0x8   :  { %58 = vst [vmem:[%s155_s1 + $0xc] sm:$0xf] %v57_v3 }
   0x9   :  { %59 = vst [vmem:[%s155_s1 + $0x2c] sm:$0xf] %v57_v3 }
   0xa   :  { %61 = vst [vmem:[%s155_s1 + $0x10] sm:$0xf] %v60_v4 }
   0xb   :  { %62 = vst [vmem:[%s155_s1 + $0x30] sm:$0xf] %v60_v4 }
   0xc   :  { %64 = vst [vmem:[%s155_s1 + $0x14] sm:$0xf] %v63_v5 }
   0xd   :  { %65 = vst [vmem:[%s155_s1 + $0x34] sm:$0xf] %v63_v5 }
   0xe   :  { %67 = vst [vmem:[%s155_s1 + $0x18] sm:$0xf] %v66_v6 }
   0xf   :  { %68 = vst [vmem:[%s155_s1 + $0x38] sm:$0xf] %v66_v6 }
  0x10   :  { %70 = vst [vmem:[%s155_s1 + $0x1c] sm:$0xf] %v69_v7 }
  0x11   :  { %71 = vst [vmem:[%s155_s1 + $0x3c] sm:$0xf] %v69_v7 }

// kernel: tile.25
= control target key start
LH: loop header
LB: loop body
LE: loop exit
PB: predicated region body
PF: predicated region fallthrough
CT: control target
= control target key end

     0   :  { %vm68_vm0 = vcmask 1047556   ;;  %s167_s9 = smov 16   ;;  %s168_s10 = smov 8   ;;  %vm70_vm1 = vcmask 64512   ;;  %vm89_vm2 = vcmask 261312   ;;  %vm110_vm3 = vcmask 195712   ;;  %s259_s0 = inlined_call_operand.vmem [shape: f32[2,8,4,8], index: 0, kind: input, shape index: {}]   ;;  %s260_s1 = inlined_call_operand.vmem [shape: f32[16,32], index: 1, kind: output, shape index: {}]  }
   0x1   :  { %v152_v0 = vld [vmem:[%s259_s0 + $0x1c] sm:$0xf]  ;;  %v153_v1 = vld [vmem:[%s259_s0 + $0x18] sm:$0xf]  ;;  %v154_v2 = vld [vmem:[%s259_s0 + $0x14] sm:$0xf] }
   0x2   :  { %39 = vst [vmem:[#allocation0 + $0x38] sm:$0xf] %v152_v0  ;;  %v155_v3 = vld [vmem:[%s259_s0 + $0x10] sm:$0xf]  ;;  %v156_v4 = vld [vmem:[%s259_s0 + $0xc] sm:$0xf] }
   0x3   :  { %43 = vst [vmem:[#allocation0 + $0x30] sm:$0xf] %v153_v1  ;;  %v157_v5 = vld [vmem:[%s259_s0 + $0x8] sm:$0xf]  ;;  %v158_v6 = vld [vmem:[%s259_s0 + $0x4] sm:$0xf] }
   0x4   :  { %47 = vst [vmem:[#allocation0 + $0x28] sm:$0xf] %v154_v2  ;;  %v64_v7 = vld [vmem:[%s259_s0] sm:$0xf]  ;;  %v144_v8 = vld [vmem:[%s259_s0 + $0x3c] sm:$0xf] }
   0x5   :  { %51 = vst [vmem:[#allocation0 + $0x20] sm:$0xf] %v155_v3  ;;  %v145_v9 = vld [vmem:[%s259_s0 + $0x38] sm:$0xf]  ;;  %v146_v10 = vld [vmem:[%s259_s0 + $0x34] sm:$0xf] }
   0x6   :  { %55 = vst [vmem:[#allocation0 + $0x18] sm:$0xf] %v156_v4  ;;  %v147_v11 = vld [vmem:[%s259_s0 + $0x30] sm:$0xf]  ;;  %v148_v12 = vld [vmem:[%s259_s0 + $0x2c] sm:$0xf] }
   0x7   :  { %59 = vst [vmem:[#allocation0 + $0x10] sm:$0xf] %v157_v5  ;;  %v149_v13 = vld [vmem:[%s259_s0 + $0x28] sm:$0xf]  ;;  %v150_v15 = vld [vmem:[%s259_s0 + $0x24] sm:$0xf] }
   0x8   :  { %63 = vst [vmem:[#allocation0 + $0x8] sm:$0xf] %v158_v6  ;;  %v151_v17 = vld [vmem:[%s259_s0 + $0x20] sm:$0xf]  ;;  %s166_s0 = smov 24   ;;  %vm131_vm4 = vcmask 130112  }
   0x9   :  { %65 = vst [vmem:[#allocation0] sm:$0xf] %v64_v7 }
   0xa   :  { %7 = vst [vmem:[#allocation0 + $0x78] sm:$0xf] %v144_v8 }
   0xb   :  { %11 = vst [vmem:[#allocation0 + $0x70] sm:$0xf] %v145_v9 }
   0xc   :  { %v84_v14 = vld [vmem:[#allocation0 + $0x3] ss:$8 sm:$0xf0]   ;;  %15 = vst [vmem:[#allocation0 + $0x68] sm:$0xf] %v146_v10 }
   0xd   :  { %v105_v16 = vld [vmem:[#allocation0 + $0x2] ss:$8 sm:$0xf0]   ;;  %19 = vst [vmem:[#allocation0 + $0x60] sm:$0xf] %v147_v11 }
   0xe   :  { %23 = vst [vmem:[#allocation0 + $0x58] sm:$0xf] %v148_v12  ;;  %v126_v18 = vld [vmem:[#allocation0 + $0x1] ss:$8 sm:$0xf0]  }
   0xf   :  { %27 = vst [vmem:[#allocation0 + $0x50] sm:$0xf] %v149_v13  ;;  %v67_v35 = vld [vmem:[#allocation0] ss:$8 sm:$0xf0]  }
  0x10   :  { %v82_v19 = vld [vmem:[#allocation0 + $0x3] ss:$8 sm:$0xf]   ;;  %v103_v20 = vld [vmem:[#allocation0 + $0x2] ss:$8 sm:$0xf]  }
  0x11   :  { %v86_v21 = vsel %vm68_vm0, %v84_v14, %v82_v19  ;;  %v107_v22 = vsel %vm68_vm0, %v105_v16, %v103_v20  ;;  %v124_v23 = vld [vmem:[#allocation0 + $0x1] ss:$8 sm:$0xf]   ;;  %31 = vst [vmem:[#allocation0 + $0x48] sm:$0xf] %v150_v15 }
  0x12   :  { %87 = vrot.lane.b32.xlu0 %v86_v21, %s166_s0  ;;  %108 = vrot.lane.b32.xlu1 %v107_v22, %s167_s9  ;;  %v128_v24 = vsel %vm68_vm0, %v126_v18, %v124_v23  ;;  %35 = vst [vmem:[#allocation0 + $0x40] sm:$0xf] %v151_v17  ;;  %v66_v34 = vld [vmem:[#allocation0] ss:$8 sm:$0xf]  }
  0x13   :  { %129 = vrot.lane.b32.xlu2 %v128_v24, %s168_s10  ;;  %v69_v36 = vsel %vm68_vm0, %v67_v35, %v66_v34 }
  0x14   :  { %v94_v25 = vld [vmem:[#allocation0 + $0x43] ss:$8 sm:$0xf0]   ;;  %v115_v26 = vld [vmem:[#allocation0 + $0x42] ss:$8 sm:$0xf0]  }
  0x15   :  { %v136_v27 = vld [vmem:[#allocation0 + $0x41] ss:$8 sm:$0xf0]   ;;  %71 = vst.msk [vmem:[%s260_s1] sm:$0xff] %vm70_vm1, %v69_v36  }
  0x16   :  { %v75_v38 = vld [vmem:[#allocation0 + $0x40] ss:$8 sm:$0xf0]  }
  0x19   :  { %v92_v28 = vld [vmem:[#allocation0 + $0x43] ss:$8 sm:$0xf]   ;;  %v113_v29 = vld [vmem:[#allocation0 + $0x42] ss:$8 sm:$0xf]  }
  0x1a   :  { %v96_v30 = vsel %vm68_vm0, %v94_v25, %v92_v28  ;;  %v117_v31 = vsel %vm68_vm0, %v115_v26, %v113_v29  ;;  %v134_v32 = vld [vmem:[#allocation0 + $0x41] ss:$8 sm:$0xf]   ;;  %v73_v37 = vld [vmem:[#allocation0 + $0x40] ss:$8 sm:$0xf]  }
  0x1b   :  { %97 = vrot.lane.b32.xlu0 %v96_v30, %s166_s0  ;;  %118 = vrot.lane.b32.xlu1 %v117_v31, %s167_s9  ;;  %v138_v33 = vsel %vm68_vm0, %v136_v27, %v134_v32  ;;  %v77_v40 = vsel %vm68_vm0, %v75_v38, %v73_v37 }
  0x1c   :  { %139 = vrot.lane.b32.xlu2 %v138_v33, %s168_s10  ;;  %159 = vst.msk [vmem:[%s260_s1 + $0x8] sm:$0xff] %vm70_vm1, %v77_v40  }
  0x6d   :  { %v130_v39 = vpop.permute.xlu2 %129  }
  0x76   :  { %v140_v41 = vpop.permute.xlu2 %139  }
  0x84   :  { %v88_v42 = vpop.permute.xlu0 %87   ;;  %v109_v43 = vpop.permute.xlu1 %108  }
  0x85   :  { %90 = vst.msk [vmem:[%s260_s1] sm:$0xff] %vm89_vm2, %v88_v42  }
  0x86   :  { %111 = vst.msk [vmem:[%s260_s1] sm:$0xff] %vm110_vm3, %v109_v43  }
  0x87   :  { %132 = vst.msk [vmem:[%s260_s1] sm:$0xff] %vm131_vm4, %v130_v39  }
  0x8d   :  { %v98_v44 = vpop.permute.xlu0 %97   ;;  %v119_v45 = vpop.permute.xlu1 %118  }
  0x8e   :  { %160 = vst.msk [vmem:[%s260_s1 + $0x8] sm:$0xff] %vm89_vm2, %v98_v44  }
  0x8f   :  { %161 = vst.msk [vmem:[%s260_s1 + $0x8] sm:$0xff] %vm110_vm3, %v119_v45  }
  0x90   :  { %162 = vst.msk [vmem:[%s260_s1 + $0x8] sm:$0xff] %vm131_vm4, %v140_v41  }

// kernel: llama_forward.1
= control target key start
LH: loop header
LB: loop body
LE: loop exit
PB: predicated region body
PF: predicated region fallthrough
CT: control target
= control target key end

     0   :  { %s1754_s17 = smov 0   ;;  %s2028_s0 = inlined_call_operand.vmem [shape: bf16[16,32], index: 0, kind: input, shape index: {}]   ;;  %s2029_s1 = inlined_call_operand.vmem [shape: f32[16,16], index: 1, kind: input, shape index: {}]   ;;  %s2030_s2 = inlined_call_operand.vmem [shape: f32[16,32], index: 2, kind: input, shape index: {}]   ;;  %s2031_s3 = inlined_call_operand.vmem [shape: f32[16,32], index: 3, kind: input, shape index: {}]   ;;  %s2032_s4 = inlined_call_operand.vmem [shape: bf16[2,2,32], index: 4, kind: input, shape index: {}]   ;;  %s2033_s5 = inlined_call_operand.vmem [shape: bf16[2,32,256], index: 5, kind: input, shape index: {}]   ;;  %s2034_s6 = inlined_call_operand.vmem [shape: bf16[2,32,32], index: 6, kind: input, shape index: {}]   ;;  %s2035_s7 = inlined_call_operand.vmem [shape: bf16[2,32,128], index: 7, kind: input, shape index: {}]   ;;  %s2036_s8 = inlined_call_operand.vmem [shape: bf16[2,64,32], index: 8, kind: input, shape index: {}]   ;;  %s2037_s9 = inlined_call_operand.vmem [shape: bf16[1,32], index: 9, kind: input, shape index: {}]   ;;  %s2038_s10 = inlined_call_operand.vmem [shape: bf16[32,128], index: 10, kind: input, shape index: {}]   ;;  %s2039_s11 = inlined_call_operand.vmem [shape: f32[16,128], index: 11, kind: output, shape index: {}]  }
   0x1 LB: > { %s1760_s18 = sadd.s32 4294967295, %s1676_s17   ;;  %p1480_p0 = scmp.ge.s32.totalorder %s1676_s17, 1  ;;  %s1676_s17 = sphi %s1754_s17, %s21_s17  }
   0x2   : > { %p370_p1 = scmp.lt.s32.totalorder %s1676_s17, 3 }
   0x4   : > { %p371_p2 = pnand %p1480_p0, %p370_p1 }
   0x5   : > { %p423_p3 = scmp.lt.s32.totalorder (!%p371_p2), %s1760_s18, 1  ;;  %p1489_p4 = scmp.ne.s32.totalorder (!%p371_p2), %s1760_s18, 0 }
   0x6   : > { %374 = sbr.rel (%p371_p2) target bundleno = 2614 (0xa36), region = 64 }
   0xb   : > { %s424_s19 = scalar_select %p423_p3, %s1760_s18, 1 }
   0xc   : > { %450 = sbr.rel (%p1489_p4) target bundleno = 20 (0x14), region = 68 }
   0xd   : > { %s1769_s22 = scalar_lea.vmem %s2032_s4, %s424_s19  ;;  %s1569_s23 = sshll.u32 %s424_s19, 5 }
   0xe   : > { %s1774_s26 = scalar_lea.vmem %s2033_s5, %s1569_s23  ;;  %s1570_s27 = sshll.u32 %s424_s19, 4 }
   0xf   : > { %s1779_s30 = scalar_lea.vmem %s2034_s6, %s1570_s27  ;;  %s1784_s14 = scalar_lea.vmem %s2035_s7, %s1570_s27 }
  0x10   : > { %s1789_s20 = scalar_lea.vmem %s2036_s8, %s1569_s23 }
  0x11   : > { %v451_v0 = vld [vmem:[%s2028_s0] sm:$0xf]  ;;  %vm453_vm0 = vcmask 257024   ;;  %v452_v1 = vld [vmem:[%s2028_s0 + $0x4] sm:$0xf] }
  0x12   : > { %454 = vst.msk [vmem:[#allocation2] sm:$0xf] %vm453_vm0, %v451_v0 }
  0x13   : > { %455 = vst.msk [vmem:[#allocation2 + $0x4] sm:$0xf] %vm453_vm0, %v452_v1 }
  0x14 PF: > { %vm463_vm1 = vcmask 261120   ;;  %v1678_v9 = vmov 32.0   ;;  %v1500_v16 = vld [vmem:[%s1774_s26 + $0x10] sm:$0xf]  ;;  %v1576_v17 = vld [vmem:[%s1774_s26 + $0x14] sm:$0xf0] }
  0x15   : > { %1616 = vrcp.f32 %v1678_v9  ;;  %v1575_v18 = vld [vmem:[%s1774_s26 + $0x14] sm:$0xf]  ;;  %v1501_v19 = vor.u32 %v1576_v17, %v1500_v16  ;;  %v1502_v20 = vld [vmem:[%s1774_s26 + $0x18] sm:$0xf0]  ;;  %v1492_v21 = vld [vmem:[%s1774_s26] sm:$0xf] }
  0x16   : > { %v1574_v22 = vld [vmem:[%s1774_s26 + $0x4] sm:$0xf0]  ;;  %v1505_v24 = vor.u32 %v1575_v18, %v1502_v20  ;;  %v1573_v25 = vld [vmem:[%s1774_s26 + $0x4] sm:$0xf]  ;;  %v1494_v26 = vld [vmem:[%s1774_s26 + $0x8] sm:$0xf0] }
  0x17   : > { %548 = vmatpush.bf16.msra.mxu0 %v1501_v19  ;;  %v1493_v28 = vor.u32 %v1574_v22, %v1492_v21  ;;  %v1497_v29 = vor.u32 %v1573_v25, %v1494_v26  ;;  %v1823_v33 = vld [vmem:[%s2030_s2] sm:$0xff]  ;;  %s1679_s29 = smov 32   ;;  %s1680_s12 = smov 96   ;;  %v1834_v39 = vld [vmem:[%s2030_s2 + $0x8] sm:$0xff]  ;;  %vm638_vm9 = vcmask 64512   ;;  %vm663_vm10 = vcmask 130048  }
  0x18   : > { %562 = vmatpush.bf16.msra.mxu1 %v1505_v24  ;;  %v572_v34 = vld [vmem:[%s2031_s3] sm:$0xff]  ;;  %600 = vrot.lane.b32.xlu1 %v1823_v33, %s1679_s29  ;;  %v573_v48 = vld [vmem:[%s2031_s3 + $0x8] sm:$0xff]  ;;  %s1681_s27 = smov 64   ;;  %s1682_s28 = smov 72  }
  0x19   : > { %v458_v47 = vld [vmem:[%s1769_s22] sm:$0x1]  ;;  %s1683_s26 = smov 88   ;;  %s1686_s13 = smov 104  }
  0x1a   : > { %v1589_v2 = vld [vmem:[#allocation2] sm:$0xff]   ;;  %v506_v51 = vpack.i.b16 %v458_v47, %v458_v47  ;;  %s1687_s15 = smov 112   ;;  %s1688_s16 = smov 48  }
  0x1b   : > { %v1798_v3 = vunpack.c.l.bf16 %v1589_v2  ;;  %v1802_v5 = vunpack.c.h.bf16 %v1589_v2  ;;  %v1617_v10 = vpop.eup %1616  ;;  %549 = vmatpush.bf16.msra.mxu0 %v1493_v28  ;;  %s1689_s21 = smov 56   ;;  %s1690_s19 = smov 40  }
  0x1c   : > { %v471_v11 = vmul.f32 32.0, %v1617_v10  ;;  %vm475_vm2 = vweird.f32 %v1617_v10  ;;  %563 = vmatpush.bf16.msra.mxu1 %v1497_v29  ;;  %v508_v55 = vperm.slane %v506_v51, 0  ;;  %s1691_s24 = smov 16   ;;  %s1692_s25 = smov 8  }
  0x1d   : > { %v461_v4 = vmul.f32 %v1798_v3, %v1798_v3  ;;  %v462_v7 = vmul.f32 %v1802_v5, %v1802_v5  ;;  %s1693_s23 = smov 24   ;;  %p1557_p5 = scmp.ne.s32.totalorder %s1760_s18, 1 }
  0x1e   : > { %v472_v12 = vsub.f32 1.0, %v471_v11  ;;  %v511_v60 = vunpack.c.l.bf16 %v508_v55 }
  0x1f   : > { %v464_v6 = vsel %vm463_vm1, %v461_v4, 0.0  ;;  %v467_v8 = vsel %vm463_vm1, %v462_v7, 0.0 }
  0x20   : > { %465 = vadd.xlane.f32.xlu0 %v464_v6  ;;  %v473_v13 = vmul.f32 %v1617_v10, %v472_v12  ;;  %602 = vrot.lane.b32.xlu1 %v1834_v39, %s1679_s29 }
  0x22   : > { %v474_v14 = vadd.f32 %v1617_v10, %v473_v13 }
  0x24   : > { %v1808_v15 = vsel %vm475_vm2, %v1617_v10, %v474_v14 }
  0x28   : > { %468 = vadd.xlane.f32.xlu0 %v467_v8  ;;  %580 = vrot.lane.b32.xlu1 %v573_v48, %s1680_s12 }
  0x3c   : > { %578 = vrot.lane.b32.xlu0 %v572_v34, %s1680_s12 }
  0x8a   : > { %v601_v1 = vpop.permute.xlu1 %600 }
  0x92   : > { %v603_v2 = vpop.permute.xlu1 %602 }
  0x93   : > { %v466_v23 = vpop.xlane.xlu0 %465 }
  0x94   : > { %v477_v27 = vmul.f32 %v1808_v15, %v466_v23 }
  0x96   : > { %v479_v30 = vadd.f32 1e-06, %v477_v27 }
  0x98   : > { %1618 = vrsqrt.f32 %v479_v30  ;;  %vm487_vm4 = vweird.f32 %v479_v30 }
  0x9a   : > { %v581_v9 = vpop.permute.xlu1 %580 }
  0x9b   : > { %v469_v31 = vpop.xlane.xlu0 %468 }
  0x9c   : > { %v478_v32 = vmul.f32 %v1808_v15, %v469_v31 }
  0x9e   : > { %v1619_v35 = vpop.eup %1618  ;;  %v480_v36 = vadd.f32 1e-06, %v478_v32 }
  0x9f   : > { %v482_v37 = vmul.f32 %v1619_v35, %v479_v30  ;;  %vm488_vm3 = vweird.f32 %v1619_v35 }
  0xa0   : > { %1620 = vrsqrt.f32 %v480_v36  ;;  %vm489_vm5 = vmor %vm487_vm4, %vm488_vm3  ;;  %vm497_vm7 = vweird.f32 %v480_v36  ;;  %vm740_vm4 = vcmask 60416  }
  0xa1   : > { %v483_v38 = vmul.f32 %v1619_v35, %v482_v37 }
  0xa3   : > { %v484_v40 = vmul.f32 0.5, %v483_v38 }
  0xa5   : > { %v485_v41 = vsub.f32 1.5, %v484_v40 }
  0xa6   : > { %v1621_v42 = vpop.eup %1620 }
  0xa7   : > { %v486_v43 = vmul.f32 %v1619_v35, %v485_v41  ;;  %v492_v44 = vmul.f32 %v1621_v42, %v480_v36  ;;  %vm498_vm6 = vweird.f32 %v1621_v42 }
  0xa8   : > { %vm499_vm8 = vmor %vm497_vm7, %vm498_vm6 }
  0xa9   : > { %v490_v45 = vsel %vm489_vm5, %v1619_v35, %v486_v43  ;;  %v493_v46 = vmul.f32 %v1621_v42, %v492_v44 }
  0xaa   : > { %v501_v50 = vmul.f32 %v1798_v3, %v490_v45 }
  0xab   : > { %v494_v49 = vmul.f32 0.5, %v493_v46  ;;  %v1866_v46 = vld [vmem:[%s2029_s1 + $0x8] sm:$0xff] }
  0xac   : > { %v503_v54 = vpack.c.bf16 %v501_v50, %v501_v50 }
  0xad   : > { %v495_v52 = vsub.f32 1.5, %v494_v49 }
  0xae   : > { %v509_v59 = vunpack.c.l.bf16 %v503_v54  ;;  %v579_v14 = vpop.permute.xlu0 %578 }
  0xaf   : > { %v496_v53 = vmul.f32 %v1621_v42, %v495_v52 }
  0xb0   : > { %v512_v62 = vmul.f32 %v511_v60, %v509_v59 }
  0xb1   : > { %v500_v56 = vsel %vm499_vm8, %v1621_v42, %v496_v53 }
  0xb2   : > { %v502_v57 = vmul.f32 %v1802_v5, %v500_v56 }
  0xb4   : > { %v504_v58 = vpack.c.bf16 %v502_v57, %v502_v57 }
  0xb6   : > { %v510_v61 = vunpack.c.l.bf16 %v504_v58 }
  0xb8   : > { %v513_v63 = vmul.f32 %v511_v60, %v510_v61 }
  0xba   : > { %v514_v0 = vpack.c.bf16 %v513_v63, %v512_v62 }
  0xbc   : > { %1506 = vmatmul.msk.bf16.vlgmr.msra.gmra.mxu0 %vm463_vm1, %v514_v0  ;;  %1507 = vmatmul.msk.bf16.vlgmr.msra.gmra.mxu1 %vm463_vm1, %v514_v0 }
 0x139   : > { %v551_v4 = vpop.f32.mrf.mxu0  ;;  %v565_v6 = vpop.f32.mrf.mxu1 }
 0x13a   : > { %v608_v7 = vmul.f32 %v572_v34, %v565_v6  ;;  %v606_v8 = vmul.f32 %v601_v1, %v551_v4  ;;  %v584_v16 = vmul.f32 %v579_v14, %v551_v4  ;;  %v574_v30 = vmul.f32 %v1823_v33, %v551_v4 }
 0x13b   : > { %v622_v51 = vpack.c.bf16 %v551_v4, %v551_v4 }
 0x13c   : > { %612 = vrot.lane.b32.xlu2 %v608_v7, %s1679_s29 }
 0x13d   : > { %v715_v53 = vunpack.c.l.b16 %v622_v51 }
 0x141   : > { %v553_v10 = vpop.f32.mrf.mxu0  ;;  %v567_v11 = vpop.f32.mrf.mxu1 }
 0x142   : > { %v609_v12 = vmul.f32 %v573_v48, %v567_v11  ;;  %v585_v13 = vmul.f32 %v581_v9, %v553_v10  ;;  %v607_v19 = vmul.f32 %v603_v2, %v553_v10  ;;  %v575_v29 = vmul.f32 %v1834_v39, %v553_v10  ;;  %v1859_v39 = vld [vmem:[%s2029_s1] sm:$0xff] }
 0x143   : > { %v623_v50 = vpack.c.bf16 %v553_v10, %v553_v10 }
 0x144   : > { %614 = vrot.lane.b32.xlu2 %v609_v12, %s1679_s29  ;;  %590 = vrot.lane.b32.xlu1 %v585_v13, %s1679_s29 }
 0x145   : > { %v716_v52 = vunpack.c.l.b16 %v623_v50 }
 0x147   : > { %v1870_v54 = vpack.c.b16 %v716_v52, %v715_v53 }
 0x14c   : > { %588 = vrot.lane.b32.xlu2 %v584_v16, %s1679_s29  ;;  %s1684_s29 = smov 80  }
 0x196   : > { %v613_v17 = vpop.permute.xlu2 %612 }
 0x197   : > { %v618_v18 = vadd.f32 %v613_v17, %v606_v8 }
 0x199   : > { %v620_v21 = vpack.c.bf16 %v618_v18, %v618_v18 }
 0x19b   : > { %v633_v24 = vunpack.c.l.b16 %v620_v21 }
 0x19e   : > { %v615_v20 = vpop.permute.xlu2 %614 }
 0x19f   : > { %v619_v22 = vadd.f32 %v615_v20, %v607_v19 }
 0x1a1   : > { %v621_v23 = vpack.c.bf16 %v619_v22, %v619_v22 }
 0x1a3   : > { %v634_v25 = vunpack.c.l.b16 %v621_v23 }
 0x1a5   : > { %v635_v26 = vpack.c.b16 %v634_v25, %v633_v24 }
 0x1a6   : > { %v589_v27 = vpop.permute.xlu2 %588 }
 0x1a7   : > { %636 = vrot.lane.b32.xlu2 %v635_v26, %s1680_s12  ;;  %v594_v32 = vadd.f32 %v589_v27, %v574_v30  ;;  %s1685_s12 = smov 120  }
 0x1a9   : > { %v596_v36 = vpack.c.bf16 %v594_v32, %v594_v32 }
 0x1ab   : > { %v628_v40 = vunpack.c.l.b16 %v596_v36 }
 0x1b6   : > { %v591_v28 = vpop.permute.xlu1 %590 }
 0x1b7   : > { %v595_v31 = vadd.f32 %v591_v28, %v575_v29 }
 0x1b9   : > { %v597_v34 = vpack.c.bf16 %v595_v31, %v595_v31 }
 0x1bb   : > { %v629_v38 = vunpack.c.l.b16 %v597_v34 }
 0x1bd   : > { %v630_v41 = vpack.c.b16 %v629_v38, %v628_v40 }
 0x201   : > { %v637_v35 = vpop.permute.xlu2 %636 }
 0x202   : > { %v643_v37 = vsel %vm638_vm9, %v637_v35, 0 }
 0x203   : > { %652 = vmatpush.bf16.xpose.msra.mxu2 %v643_v37 }
 0x20a   : > { %1508 = vmatmul.msk.bf16.vlgmr.msra.gmra.mxu2 %vm638_vm9, %v630_v41 }
 0x28d   : > { %v654_v42 = vpop.f32.mrf.mxu2 }
 0x28e   : > { %v659_v33 = vmul.f32 0.35355338, %v654_v42 }
 0x290   : > { %v661_v43 = vadd.f32 %v659_v33, %v1859_v39 }
 0x292   : > { %v664_v44 = vsel %vm663_vm10, %v661_v43, -inf }
 0x293   : > { %665 = vmax.xlane.f32.xlu1 %v664_v44 }
 0x295   : > { %v656_v45 = vpop.f32.mrf.mxu2 }
 0x296   : > { %v660_v47 = vmul.f32 0.35355338, %v656_v45 }
 0x298   : > { %v662_v48 = vadd.f32 %v660_v47, %v1866_v46 }
 0x29a   : > { %v667_v49 = vsel %vm663_vm10, %v662_v48, -inf }
 0x29b   : > { %668 = vmax.xlane.f32.xlu2 %v667_v49 }
 0x2ac   : > { %718 = vrot.lane.b32.xlu1 %v1870_v54, %s1681_s27 }
 0x2b4   : > { %965 = vrot.lane.b32.xlu1 %v635_v26, %s1682_s28 }
 0x306   : > { %v666_v55 = vpop.xlane.xlu1 %665 }
 0x307   : > { %v670_v56 = vsub.f32 %v661_v43, %v666_v55 }
 0x309   : > { %v672_v57 = vmul.f32 1.442695, %v670_v56 }
 0x30b   : > { %1622 = vpow2.f32 %v672_v57 }
 0x30e   : > { %v669_v58 = vpop.xlane.xlu2 %668 }
 0x30f   : > { %v671_v59 = vsub.f32 %v662_v48, %v669_v58 }
 0x311   : > { %v1623_v60 = vpop.eup %1622  ;;  %v674_v61 = vmul.f32 1.442695, %v671_v59 }
 0x312   : > { %v676_v62 = vsel %vm663_vm10, %v1623_v60, 0.0 }
 0x313   : > { %1624 = vpow2.f32 %v674_v61  ;;  %677 = vadd.xlane.f32.xlu0 %v676_v62 }
 0x319   : > { %v1625_v63 = vpop.eup %1624 }
 0x31a   : > { %v679_v0 = vsel %vm663_vm10, %v1625_v63, 0.0 }
 0x31b   : > { %680 = vadd.xlane.f32.xlu2 %v679_v0 }
 0x31e   : > { %v719_v1 = vpop.permute.xlu1 %718 }
 0x31f   : > { %731 = vmatpush.bf16.msra.mxu3 %v719_v1 }
 0x326   : > { %v966_v34 = vpop.permute.xlu1 %965 }
 0x327   : > { %745 = vrot.lane.b32.xlu0 %v635_v26, %s1683_s26  ;;  %v971_v38 = vsel %vm638_vm9, %v966_v34, 0 }
 0x32f   : > { %855 = vrot.lane.b32.xlu0 %v635_v26, %s1684_s29 }
 0x333   : > { %743 = vrot.lane.b32.xlu2 %v630_v41, %s1685_s12 }
 0x337   : > { %963 = vrot.lane.b32.xlu0 %v630_v41, %s1686_s13 }
 0x33b   : > { %853 = vrot.lane.b32.xlu2 %v630_v41, %s1687_s15 }
 0x386   : > { %v678_v2 = vpop.xlane.xlu0 %677 }
 0x387   : > { %1626 = vrcp.f32 %v678_v2  ;;  %v693_v13 = vand.u32 2147483648, %v678_v2  ;;  %vm687_vm12 = vweird.f32 %v678_v2  ;;  %v691_v14 = vand.u32 2147483647, %v678_v2 }
 0x389   : > { %v694_v24 = vor.u32 1.1754944e-38, %v693_v13  ;;  %vm692_vm15 = vcmp.eq.f32.partialorder %v691_v14, 8.507059e+37 }
 0x38d   : > { %v1627_v4 = vpop.eup %1626 }
 0x38e   : > { %v683_v6 = vmul.f32 %v1627_v4, %v678_v2  ;;  %v681_v7 = vpop.xlane.xlu2 %680  ;;  %vm688_vm11 = vweird.f32 %v1627_v4 }
 0x38f   : > { %1628 = vrcp.f32 %v681_v7  ;;  %vm1876_vm13 = vmor %vm687_vm12, %vm688_vm11  ;;  %v706_v18 = vand.u32 2147483647, %v681_v7  ;;  %v708_v19 = vand.u32 2147483648, %v681_v7  ;;  %vm702_vm0 = vweird.f32 %v681_v7 }
 0x390   : > { %v684_v8 = vsub.f32 1.0, %v683_v6 }
 0x391   : > { %v709_v26 = vor.u32 1.1754944e-38, %v708_v19  ;;  %vm707_vm3 = vcmp.eq.f32.partialorder %v706_v18, 8.507059e+37 }
 0x392   : > { %v685_v9 = vmul.f32 %v1627_v4, %v684_v8 }
 0x394   : > { %v686_v11 = vadd.f32 %v1627_v4, %v685_v9 }
 0x395   : > { %v1629_v10 = vpop.eup %1628 }
 0x396   : > { %v698_v12 = vmul.f32 %v1629_v10, %v681_v7  ;;  %vm703_vm14 = vweird.f32 %v1629_v10  ;;  %v690_v23 = vsel %vm1876_vm13, %v1627_v4, %v686_v11  ;;  %v744_v29 = vpop.permute.xlu2 %743 }
 0x397   : > { %vm704_vm2 = vmor %vm702_vm0, %vm703_vm14  ;;  %v695_v27 = vsel %vm692_vm15, %v694_v24, %v690_v23 }
 0x398   : > { %v699_v16 = vsub.f32 1.0, %v698_v12  ;;  %v696_v31 = vmul.f32 %v1623_v60, %v695_v27 }
 0x399   : > { %v746_v20 = vpop.permute.xlu0 %745 }
 0x39a   : > { %v700_v21 = vmul.f32 %v1629_v10, %v699_v16  ;;  %v751_v22 = vsel %vm638_vm9, %v746_v20, 0 }
 0x39b   : > { %760 = vmatpush.bf16.xpose.msrb.mxu3 %v751_v22 }
 0x39c   : > { %v701_v25 = vadd.f32 %v1629_v10, %v700_v21 }
 0x39e   : > { %v705_v28 = vsel %vm704_vm2, %v1629_v10, %v701_v25  ;;  %v854_v40 = vpop.permute.xlu2 %853 }
 0x39f   : > { %v710_v30 = vsel %vm707_vm3, %v709_v26, %v705_v28 }
 0x3a0   : > { %v711_v32 = vmul.f32 %v1625_v63, %v710_v30 }
 0x3a1   : > { %v856_v35 = vpop.permute.xlu0 %855 }
 0x3a2   : > { %v861_v36 = vsel %vm638_vm9, %v856_v35, 0  ;;  %v712_v37 = vpack.c.bf16 %v711_v32, %v696_v31 }
 0x3a3   : > { %870 = vmatpush.bf16.xpose.msrb.mxu1 %v861_v36 }
 0x3a4   : > { %1509 = vmatmul.msk.bf16.vlgmr.msra.gmra.mxu3 %vm663_vm10, %v712_v37 }
 0x3a5   : > { %980 = vmatpush.bf16.xpose.msra.mxu3 %v971_v38 }
 0x3a9   : > { %v964_v41 = vpop.permute.xlu0 %963 }
 0x3aa   : > { %1512 = vmatmul.msk.bf16.vlgmr.msrb.gmra.mxu1 %vm638_vm9, %v854_v40 }
 0x3b4   : > { %1510 = vmatmul.msk.bf16.vlgmr.msrb.gmra.mxu3 %vm638_vm9, %v744_v29 }
 0x3c4   : > { %1514 = vmatmul.msk.bf16.vlgmr.msra.gmra.mxu3 %vm638_vm9, %v964_v41 }
 0x427   : > { %v733_v42 = vpop.f32.mrf.mxu3  ;;  %v872_v33 = vpop.f32.mrf.mxu1 }
 0x428   : > { %v738_v43 = vpack.c.bf16 %v733_v42, %v733_v42  ;;  %v877_v44 = vmul.f32 0.35355338, %v872_v33 }
 0x42a   : > { %741 = vst.msk [vmem:[#allocation3] sm:$0xf] %vm740_vm4, %v738_v43  ;;  %v879_v45 = vadd.f32 %v877_v44, %v1859_v39 }
 0x42c   : > { %v881_v47 = vsel %vm663_vm10, %v879_v45, -inf }
 0x42d   : > { %882 = vmax.xlane.f32.xlu0 %v881_v47 }
 0x42f   : > { %v735_v48 = vpop.f32.mrf.mxu3  ;;  %v874_v52 = vpop.f32.mrf.mxu1 }
 0x430   : > { %v739_v49 = vpack.c.bf16 %v735_v48, %v735_v48  ;;  %v878_v55 = vmul.f32 0.35355338, %v874_v52 }
 0x432   : > { %742 = vst.msk [vmem:[#allocation3 + $0x4] sm:$0xf] %vm740_vm4, %v739_v49  ;;  %v880_v59 = vadd.f32 %v878_v55, %v1866_v46 }
 0x434   : > { %v884_v62 = vsel %vm663_vm10, %v880_v59, -inf }
 0x437   : > { %v762_v50 = vpop.f32.mrf.mxu3 }
 0x438   : > { %v767_v51 = vmul.f32 0.35355338, %v762_v50 }
 0x43a   : > { %v769_v53 = vadd.f32 %v767_v51, %v1859_v39 }
 0x43c   : > { %v771_v56 = vsel %vm663_vm10, %v769_v53, -inf }
 0x43d   : > { %772 = vmax.xlane.f32.xlu1 %v771_v56 }
 0x43f   : > { %v764_v57 = vpop.f32.mrf.mxu3 }
 0x440   : > { %v768_v58 = vmul.f32 0.35355338, %v764_v57 }
 0x442   : > { %v770_v60 = vadd.f32 %v768_v58, %v1866_v46 }
 0x444   : > { %v774_v61 = vsel %vm663_vm10, %v770_v60, -inf }
 0x445   : > { %775 = vmax.xlane.f32.xlu2 %v774_v61  ;;  %885 = vmax.xlane.f32.xlu1 %v884_v62 }
 0x447   : > { %v982_v63 = vpop.f32.mrf.mxu3 }
 0x448   : > { %v987_v0 = vmul.f32 0.35355338, %v982_v63 }
 0x44a   : > { %v989_v1 = vadd.f32 %v987_v0, %v1859_v39 }
 0x44c   : > { %v991_v2 = vsel %vm663_vm10, %v989_v1, -inf }
 0x44d   : > { %992 = vmax.xlane.f32.xlu2 %v991_v2 }
 0x44f   : > { %v984_v4 = vpop.f32.mrf.mxu3 }
 0x450   : > { %v988_v6 = vmul.f32 0.35355338, %v984_v4 }
 0x452   : > { %v990_v7 = vadd.f32 %v988_v6, %v1866_v46 }
 0x454   : > { %v994_v8 = vsel %vm663_vm10, %v990_v7, -inf }
 0x455   : > { %995 = vmax.xlane.f32.xlu0 %v994_v8 }
 0x4a0   : > { %v883_v9 = vpop.xlane.xlu0 %882 }
 0x4a1   : > { %v887_v10 = vsub.f32 %v879_v45, %v883_v9 }
 0x4a3   : > { %v889_v11 = vmul.f32 1.442695, %v887_v10 }
 0x4a5   : > { %1630 = vpow2.f32 %v889_v11 }
 0x4ab   : > { %v1901_v12 = vpop.eup %1630 }
 0x4ac   : > { %v893_v13 = vsel %vm663_vm10, %v1901_v12, 0.0 }
 0x4ad   : > { %894 = vadd.xlane.f32.xlu0 %v893_v13 }
 0x4b0   : > { %v773_v39 = vpop.xlane.xlu1 %772 }
 0x4b1   : > { %v777_v19 = vsub.f32 %v769_v53, %v773_v39 }
 0x4b3   : > { %v779_v21 = vmul.f32 1.442695, %v777_v19 }
 0x4b8   : > { %v886_v14 = vpop.xlane.xlu1 %885  ;;  %v776_v16 = vpop.xlane.xlu2 %775 }
 0x4b9   : > { %v888_v17 = vsub.f32 %v880_v59, %v886_v14  ;;  %v778_v18 = vsub.f32 %v770_v60, %v776_v16 }
 0x4bb   : > { %v891_v46 = vmul.f32 1.442695, %v888_v17  ;;  %v781_v20 = vmul.f32 1.442695, %v778_v18 }
 0x4bd   : > { %1632 = vpow2.f32 %v891_v46 }
 0x4be   : > { %1634 = vpow2.f32 %v781_v20 }
 0x4bf   : > { %1636 = vpow2.f32 %v779_v21 }
 0x4c0   : > { %v993_v22 = vpop.xlane.xlu2 %992 }
 0x4c1   : > { %v997_v23 = vsub.f32 %v989_v1, %v993_v22 }
 0x4c3   : > { %v1905_v24 = vpop.eup %1632  ;;  %v999_v25 = vmul.f32 1.442695, %v997_v23 }
 0x4c4   : > { %v1907_v26 = vpop.eup %1634  ;;  %v896_v27 = vsel %vm663_vm10, %v1905_v24, 0.0 }
 0x4c5   : > { %1638 = vpow2.f32 %v999_v25  ;;  %897 = vadd.xlane.f32.xlu1 %v896_v27  ;;  %v786_v28 = vsel %vm663_vm10, %v1907_v26, 0.0  ;;  %v1913_v30 = vpop.eup %1636 }
 0x4c6   : > { %787 = vadd.xlane.f32.xlu2 %v786_v28  ;;  %v783_v35 = vsel %vm663_vm10, %v1913_v30, 0.0 }
 0x4c8   : > { %v996_v29 = vpop.xlane.xlu0 %995 }
 0x4c9   : > { %v998_v31 = vsub.f32 %v990_v7, %v996_v29 }
 0x4cb   : > { %v1915_v32 = vpop.eup %1638  ;;  %v1001_v34 = vmul.f32 1.442695, %v998_v31 }
 0x4cc   : > { %v1003_v36 = vsel %vm663_vm10, %v1915_v32, 0.0 }
 0x4cd   : > { %1640 = vpow2.f32 %v1001_v34  ;;  %784 = vadd.xlane.f32.xlu1 %v783_v35 }
 0x4ce   : > { %1004 = vadd.xlane.f32.xlu2 %v1003_v36 }
 0x4d3   : > { %v1921_v37 = vpop.eup %1640 }
 0x4d4   : > { %v1006_v38 = vsel %vm663_vm10, %v1921_v37, 0.0 }
 0x4d5   : > { %1007 = vadd.xlane.f32.xlu0 %v1006_v38 }
 0x4e6   : > { %930 = vrot.lane.b32.xlu2 %v1870_v54, %s1688_s16  ;;  %820 = vrot.lane.b32.xlu1 %v1870_v54, %s1689_s21 }
 0x4e9   : > { %1040 = vrot.lane.b32.xlu0 %v1870_v54, %s1690_s19 }
 0x520   : > { %v895_v40 = vpop.xlane.xlu0 %894 }
 0x521   : > { %1642 = vrcp.f32 %v895_v40  ;;  %vm904_vm6 = vweird.f32 %v895_v40  ;;  %v910_v55 = vand.u32 2147483648, %v895_v40  ;;  %v908_v57 = vand.u32 2147483647, %v895_v40 }
 0x523   : > { %v911_v1 = vor.u32 1.1754944e-38, %v910_v55  ;;  %vm909_vm12 = vcmp.eq.f32.partialorder %v908_v57, 8.507059e+37 }
 0x527   : > { %v1643_v41 = vpop.eup %1642 }
 0x528   : > { %v900_v42 = vmul.f32 %v1643_v41, %v895_v40  ;;  %vm905_vm5 = vweird.f32 %v1643_v41 }
 0x529   : > { %vm1937_vm7 = vmor %vm904_vm6, %vm905_vm5 }
 0x52a   : > { %v901_v43 = vsub.f32 1.0, %v900_v42 }
 0x52c   : > { %v902_v45 = vmul.f32 %v1643_v41, %v901_v43 }
 0x52e   : > { %v903_v51 = vadd.f32 %v1643_v41, %v902_v45 }
 0x530   : > { %v907_v59 = vsel %vm1937_vm7, %v1643_v41, %v903_v51 }
 0x531   : > { %v912_v9 = vsel %vm909_vm12, %v911_v1, %v907_v59 }
 0x532   : > { %v913_v14 = vmul.f32 %v1901_v12, %v912_v9  ;;  %v1578_v9 = vld [vmem:[%s1779_s30] sm:$0xff] }
 0x538   : > { %v898_v33 = vpop.xlane.xlu1 %897 }
 0x539   : > { %1644 = vrcp.f32 %v898_v33  ;;  %v1928_v44 = vpop.xlane.xlu2 %787  ;;  %v925_v60 = vand.u32 2147483648, %v898_v33  ;;  %vm919_vm9 = vweird.f32 %v898_v33  ;;  %v923_v62 = vand.u32 2147483647, %v898_v33 }
 0x53a   : > { %1646 = vrcp.f32 %v1928_v44  ;;  %v815_v23 = vand.u32 2147483648, %v1928_v44  ;;  %vm809_vm3 = vweird.f32 %v1928_v44  ;;  %v813_v12 = vand.u32 2147483647, %v1928_v44 }
 0x53b   : > { %v926_v7 = vor.u32 1.1754944e-38, %v925_v60  ;;  %vm924_vm13 = vcmp.eq.f32.partialorder %v923_v62, 8.507059e+37 }
 0x53c   : > { %v816_v31 = vor.u32 1.1754944e-38, %v815_v23  ;;  %vm814_vm6 = vcmp.eq.f32.partialorder %v813_v12, 8.507059e+37 }
 0x53f   : > { %v1645_v47 = vpop.eup %1644 }
 0x540   : > { %v1931_v48 = vpop.eup %1646  ;;  %v915_v49 = vmul.f32 %v1645_v47, %v898_v33  ;;  %v785_v50 = vpop.xlane.xlu1 %784  ;;  %vm920_vm8 = vweird.f32 %v1645_v47 }
 0x541   : > { %1648 = vrcp.f32 %v785_v50  ;;  %v1933_v54 = vpop.xlane.xlu2 %1004  ;;  %v805_v53 = vmul.f32 %v1931_v48, %v1928_v44  ;;  %vm921_vm11 = vmor %vm919_vm9, %vm920_vm8  ;;  %vm810_vm15 = vweird.f32 %v1931_v48  ;;  %vm794_vm0 = vweird.f32 %v785_v50 }
 0x542   : > { %v916_v52 = vsub.f32 1.0, %v915_v49  ;;  %1650 = vrcp.f32 %v1933_v54  ;;  %v800_v17 = vand.u32 2147483648, %v785_v50  ;;  %v798_v20 = vand.u32 2147483647, %v785_v50  ;;  %vm811_vm4 = vmor %vm809_vm3, %vm810_vm15 }
 0x543   : > { %v806_v63 = vsub.f32 1.0, %v805_v53  ;;  %vm1014_vm12 = vweird.f32 %v1933_v54 }
 0x544   : > { %v917_v58 = vmul.f32 %v1645_v47, %v916_v52  ;;  %v801_v27 = vor.u32 1.1754944e-38, %v800_v17  ;;  %vm799_vm5 = vcmp.eq.f32.partialorder %v798_v20, 8.507059e+37 }
 0x545   : > { %v807_v10 = vmul.f32 %v1931_v48, %v806_v63 }
 0x546   : > { %v918_v61 = vadd.f32 %v1645_v47, %v917_v58 }
 0x547   : > { %v1649_v0 = vpop.eup %1648  ;;  %v808_v19 = vadd.f32 %v1931_v48, %v807_v10 }
 0x548   : > { %v922_v2 = vsel %vm921_vm11, %v1645_v47, %v918_v61  ;;  %v790_v4 = vmul.f32 %v1649_v0, %v785_v50  ;;  %v1944_v6 = vpop.xlane.xlu0 %1007  ;;  %vm795_vm14 = vweird.f32 %v1649_v0  ;;  %v1651_v18 = vpop.eup %1650  ;;  %v1020_v50 = vand.u32 2147483648, %v1933_v54 }
 0x549   : > { %1652 = vrcp.f32 %v1944_v6  ;;  %v931_v8 = vpop.permute.xlu2 %930  ;;  %v927_v13 = vsel %vm924_vm13, %v926_v7, %v922_v2  ;;  %vm796_vm2 = vmor %vm794_vm0, %vm795_vm14  ;;  %v812_v28 = vsel %vm811_vm4, %v1931_v48, %v808_v19  ;;  %v1010_v29 = vmul.f32 %v1651_v18, %v1933_v54 }
 0x54a   : > { %v791_v11 = vsub.f32 1.0, %v790_v4  ;;  %943 = vmatpush.bf16.msrb.mxu2 %v931_v8  ;;  %v928_v16 = vmul.f32 %v1905_v24, %v927_v13  ;;  %v817_v36 = vsel %vm814_vm6, %v816_v31, %v812_v28  ;;  %v1035_v48 = vand.u32 2147483648, %v1944_v6  ;;  %v1579_v8 = vld [vmem:[%s1779_s30 + $0x8] sm:$0xff] }
 0x54b   : > { %v1011_v38 = vsub.f32 1.0, %v1010_v29  ;;  %v818_v33 = vmul.f32 %v1907_v26, %v817_v36  ;;  %vm1015_vm8 = vweird.f32 %v1651_v18  ;;  %vm1029_vm9 = vweird.f32 %v1944_v6  ;;  %1105 = vmatpush.bf16.msra.mxu1 %v1579_v8 }
 0x54c   : > { %v792_v39 = vmul.f32 %v1649_v0, %v791_v11  ;;  %v929_v21 = vpack.c.bf16 %v928_v16, %v913_v14  ;;  %v1018_v26 = vand.u32 2147483647, %v1933_v54  ;;  %vm1016_vm13 = vmor %vm1014_vm12, %vm1015_vm8  ;;  %v1036_v52 = vor.u32 1.1754944e-38, %v1035_v48  ;;  %v1121_v48 = vld [vmem:[%s1769_s22] sm:$0x1] }
 0x54d   : > { %v1012_v43 = vmul.f32 %v1651_v18, %v1011_v38  ;;  %v1021_v55 = vor.u32 1.1754944e-38, %v1020_v50  ;;  %vm960_vm0 = vcmask 191616  }
 0x54e   : > { %v793_v46 = vadd.f32 %v1649_v0, %v792_v39  ;;  %1513 = vmatmul.msk.bf16.vlgmr.msrb.gmra.mxu2 %vm663_vm10, %v929_v21  ;;  %vm1019_vm15 = vcmp.eq.f32.partialorder %v1018_v26, 8.507059e+37 }
 0x54f   : > { %v1653_v22 = vpop.eup %1652  ;;  %v1013_v49 = vadd.f32 %v1651_v18, %v1012_v43  ;;  %1106 = vmatpush.bf16.msra.mxu1 %v1578_v9 }
 0x550   : > { %v797_v25 = vsel %vm796_vm2, %v1649_v0, %v793_v46  ;;  %v1025_v24 = vmul.f32 %v1653_v22, %v1944_v6  ;;  %vm1030_vm7 = vweird.f32 %v1653_v22  ;;  %vm1070_vm2 = vcmask 257216  }
 0x551   : > { %v802_v34 = vsel %vm799_vm5, %v801_v27, %v797_v25  ;;  %vm1031_vm11 = vmor %vm1029_vm9, %vm1030_vm7  ;;  %v1017_v53 = vsel %vm1016_vm13, %v1651_v18, %v1013_v49 }
 0x552   : > { %v1026_v35 = vsub.f32 1.0, %v1025_v24  ;;  %v803_v40 = vmul.f32 %v1913_v30, %v802_v34  ;;  %v1033_v30 = vand.u32 2147483647, %v1944_v6  ;;  %v1022_v57 = vsel %vm1019_vm15, %v1021_v55, %v1017_v53 }
 0x553   : > { %v1023_v59 = vmul.f32 %v1915_v32, %v1022_v57 }
 0x554   : > { %v1027_v41 = vmul.f32 %v1653_v22, %v1026_v35  ;;  %v819_v44 = vpack.c.bf16 %v818_v33, %v803_v40  ;;  %vm1034_vm14 = vcmp.eq.f32.partialorder %v1033_v30, 8.507059e+37  ;;  %v1581_v40 = vld [vmem:[%s1784_s14 + $0x8] sm:$0xff] }
 0x555   : > { %1196 = vmatpush.bf16.msra.mxu2 %v1581_v40 }
 0x556   : > { %v1028_v47 = vadd.f32 %v1653_v22, %v1027_v41 }
 0x558   : > { %v821_v42 = vpop.permute.xlu1 %820  ;;  %v1032_v51 = vsel %vm1031_vm11, %v1653_v22, %v1028_v47 }
 0x559   : > { %833 = vmatpush.bf16.msrb.mxu0 %v821_v42  ;;  %v1037_v56 = vsel %vm1034_vm14, %v1036_v52, %v1032_v51  ;;  %v1161_v51 = vshrl.u32 %v1121_v48, 16 }
 0x55a   : > { %v1038_v58 = vmul.f32 %v1921_v37, %v1037_v56 }
 0x55b   : > { %v1041_v45 = vpop.permute.xlu0 %1040  ;;  %v1162_v56 = vpack.i.b16 %v1161_v51, %v1161_v51 }
 0x55c   : > { %1511 = vmatmul.msk.bf16.vlgmr.msrb.gmra.mxu0 %vm663_vm10, %v819_v44  ;;  %v1039_v60 = vpack.c.bf16 %v1038_v58, %v1023_v59 }
 0x55d   : > { %1053 = vmatpush.bf16.msra.mxu0 %v1041_v45 }
 0x56c   : > { %1515 = vmatmul.msk.bf16.vlgmr.msra.gmra.mxu0 %vm663_vm10, %v1039_v60  ;;  %vm850_vm10 = vcmask 126016   ;;  %v1164_v60 = vperm.slane %v1162_v56, 0 }
 0x5d1   : > { %v945_v61 = vpop.f32.mrf.mxu2 }
 0x5d2   : > { %v950_v62 = vpack.c.bf16 %v945_v61, %v945_v61 }
 0x5d4   : > { %954 = vrot.lane.b32.xlu2 %v950_v62, %s1691_s24 }
 0x5d9   : > { %v835_v54 = vpop.f32.mrf.mxu0  ;;  %v947_v0 = vpop.f32.mrf.mxu2 }
 0x5da   : > { %v840_v63 = vpack.c.bf16 %v835_v54, %v835_v54  ;;  %v951_v2 = vpack.c.bf16 %v947_v0, %v947_v0 }
 0x5dc   : > { %844 = vrot.lane.b32.xlu1 %v840_v63, %s1692_s25  ;;  %v1167_v63 = vunpack.c.l.bf16 %v1164_v60 }
 0x5e1   : > { %v837_v1 = vpop.f32.mrf.mxu0 }
 0x5e2   : > { %v841_v4 = vpack.c.bf16 %v837_v1, %v837_v1 }
 0x5e4   : > { %846 = vrot.lane.b32.xlu0 %v841_v4, %s1692_s25  ;;  %956 = vrot.lane.b32.xlu1 %v951_v2, %s1691_s24 }
 0x5e9   : > { %v1055_v32 = vpop.f32.mrf.mxu0 }
 0x5ea   : > { %v1060_v37 = vpack.c.bf16 %v1055_v32, %v1055_v32 }
 0x5ec   : > { %1064 = vrot.lane.b32.xlu0 %v1060_v37, %s1693_s23 }
 0x5f1   : > { %v1057_v6 = vpop.f32.mrf.mxu0 }
 0x5f2   : > { %v1061_v7 = vpack.c.bf16 %v1057_v6, %v1057_v6 }
 0x5f4   : > { %1066 = vrot.lane.b32.xlu2 %v1061_v7, %s1693_s23  ;;  %v1585_v7 = vld [vmem:[%s1789_s20 + $0x18] sm:$0xff] }
 0x5f5   : > { %1295 = vmatpush.bf16.msrb.mxu3 %v1585_v7 }
 0x62e   : > { %v955_v11 = vpop.permute.xlu2 %954 }
 0x64e   : > { %v845_v10 = vpop.permute.xlu1 %844  ;;  %v1067_v14 = vpop.permute.xlu2 %1066 }
 0x64f   : > { %851 = vst.msk [vmem:[#allocation3] sm:$0xf] %vm850_vm10, %v845_v10 }
 0x650   : > { %961 = vst.msk [vmem:[#allocation3] sm:$0xf] %vm960_vm0, %v955_v11 }
 0x656   : > { %v847_v13 = vpop.permute.xlu0 %846  ;;  %v957_v39 = vpop.permute.xlu1 %956 }
 0x657   : > { %852 = vst.msk [vmem:[#allocation3 + $0x4] sm:$0xf] %vm850_vm10, %v847_v13 }
 0x658   : > { %962 = vst.msk [vmem:[#allocation3 + $0x4] sm:$0xf] %vm960_vm0, %v957_v39  ;;  %v1584_v39 = vld [vmem:[%s1789_s20 + $0x10] sm:$0xff] }
 0x659   : > { %1072 = vst.msk [vmem:[#allocation3 + $0x4] sm:$0xf] %vm1070_vm2, %v1067_v14  ;;  %1296 = vmatpush.bf16.msrb.mxu3 %v1584_v39 }
 0x65e   : > { %v1065_v16 = vpop.permute.xlu0 %1064 }
 0x65f   : > { %1071 = vst.msk [vmem:[#allocation3] sm:$0xf] %vm1070_vm2, %v1065_v16  ;;  %v1583_v16 = vld [vmem:[%s1789_s20 + $0x8] sm:$0xff]  ;;  %vm1287_vm2 = vcmask 523264  }
 0x660   : > { %1297 = vmatpush.bf16.msrb.mxu3 %v1583_v16 }
 0x666   : > { %v1577_v17 = vld [vmem:[#allocation3] sm:$0xff] }
 0x667   : > { %1528 = vmatmul.msk.bf16.vlgmr.msra.gmra.mxu1 %vm463_vm1, %v1577_v17 }
 0x6e4   : > { %v1108_v18 = vpop.f32.mrf.mxu1 }
 0x6e5   : > { %v1113_v19 = vpack.c.bf16 %v1108_v18, %v1108_v18  ;;  %v1582_v18 = vld [vmem:[%s1789_s20] sm:$0xff] }
 0x6e6   : > { %1298 = vmatpush.bf16.msrb.mxu3 %v1582_v18 }
 0x6e7   : > { %v1115_v46 = vunpack.c.l.bf16 %v1113_v19 }
 0x6e9   : > { %v1117_v20 = vadd.f32 %v1798_v3, %v1115_v46 }
 0x6eb   : > { %v1119_v21 = vpack.c.bf16 %v1117_v20, %v1117_v20 }
 0x6ec   : > { %v1110_v22 = vpop.f32.mrf.mxu1 }
 0x6ed   : > { %v1977_v23 = vunpack.c.l.bf16 %v1119_v21  ;;  %v1114_v12 = vpack.c.bf16 %v1110_v22, %v1110_v22 }
 0x6ef   : > { %v1116_v25 = vunpack.c.l.bf16 %v1114_v12  ;;  %v1124_v24 = vmul.f32 %v1977_v23, %v1977_v23 }
 0x6f1   : > { %v1118_v27 = vadd.f32 %v1802_v5, %v1116_v25  ;;  %v1126_v28 = vsel %vm463_vm1, %v1124_v24, 0.0  ;;  %v1580_v5 = vld [vmem:[%s1784_s14] sm:$0xff] }
 0x6f2   : > { %1127 = vadd.xlane.f32.xlu1 %v1126_v28  ;;  %1197 = vmatpush.bf16.msra.mxu2 %v1580_v5 }
 0x6f3   : > { %v1120_v29 = vpack.c.bf16 %v1118_v27, %v1118_v27 }
 0x6f5   : > { %v1983_v31 = vunpack.c.l.bf16 %v1120_v29 }
 0x6f7   : > { %v1125_v3 = vmul.f32 %v1983_v31, %v1983_v31 }
 0x6f9   : > { %v1129_v34 = vsel %vm463_vm1, %v1125_v3, 0.0 }
 0x6fa   : > { %1130 = vadd.xlane.f32.xlu0 %v1129_v34 }
 0x765   : > { %v1128_v35 = vpop.xlane.xlu1 %1127 }
 0x766   : > { %v1132_v36 = vmul.f32 %v1128_v35, %v1808_v15 }
 0x768   : > { %v1134_v38 = vadd.f32 1e-06, %v1132_v36 }
 0x76a   : > { %1654 = vrsqrt.f32 %v1134_v38  ;;  %vm1142_vm4 = vweird.f32 %v1134_v38 }
 0x76d   : > { %v1131_v41 = vpop.xlane.xlu0 %1130 }
 0x76e   : > { %v1133_v42 = vmul.f32 %v1131_v41, %v1808_v15 }
 0x770   : > { %v1655_v33 = vpop.eup %1654  ;;  %v1135_v43 = vadd.f32 1e-06, %v1133_v42 }
 0x771   : > { %v1137_v44 = vmul.f32 %v1655_v33, %v1134_v38  ;;  %vm1143_vm3 = vweird.f32 %v1655_v33 }
 0x772   : > { %1656 = vrsqrt.f32 %v1135_v43  ;;  %vm1144_vm5 = vmor %vm1142_vm4, %vm1143_vm3  ;;  %vm1152_vm7 = vweird.f32 %v1135_v43  ;;  %vm1313_vm3 = vcmask 257024  }
 0x773   : > { %v1138_v45 = vmul.f32 %v1655_v33, %v1137_v44 }
 0x775   : > { %v1139_v47 = vmul.f32 0.5, %v1138_v45 }
 0x777   : > { %v1140_v49 = vsub.f32 1.5, %v1139_v47 }
 0x778   : > { %v1657_v30 = vpop.eup %1656 }
 0x779   : > { %v1141_v50 = vmul.f32 %v1655_v33, %v1140_v49  ;;  %v1147_v26 = vmul.f32 %v1657_v30, %v1135_v43  ;;  %vm1153_vm6 = vweird.f32 %v1657_v30 }
 0x77a   : > { %vm1154_vm8 = vmor %vm1152_vm7, %vm1153_vm6 }
 0x77b   : > { %v1145_v52 = vsel %vm1144_vm5, %v1655_v33, %v1141_v50  ;;  %v1148_v53 = vmul.f32 %v1657_v30, %v1147_v26 }
 0x77c   : > { %v1156_v57 = vmul.f32 %v1145_v52, %v1977_v23 }
 0x77d   : > { %v1149_v55 = vmul.f32 0.5, %v1148_v53 }
 0x77e   : > { %v1158_v61 = vpack.c.bf16 %v1156_v57, %v1156_v57 }
 0x77f   : > { %v1150_v58 = vsub.f32 1.5, %v1149_v55 }
 0x780   : > { %v1165_v0 = vunpack.c.l.bf16 %v1158_v61 }
 0x781   : > { %v1151_v59 = vmul.f32 %v1657_v30, %v1150_v58 }
 0x782   : > { %v1168_v4 = vmul.f32 %v1167_v63, %v1165_v0 }
 0x783   : > { %v1155_v62 = vsel %vm1154_vm8, %v1657_v30, %v1151_v59 }
 0x784   : > { %v1157_v54 = vmul.f32 %v1155_v62, %v1983_v31 }
 0x786   : > { %v1159_v1 = vpack.c.bf16 %v1157_v54, %v1157_v54 }
 0x788   : > { %v1166_v2 = vunpack.c.l.bf16 %v1159_v1 }
 0x78a   : > { %v1169_v32 = vmul.f32 %v1167_v63, %v1166_v2 }
 0x78c   : > { %v1170_v37 = vpack.c.bf16 %v1169_v32, %v1168_v4 }
 0x78e   : > { %1537 = vmatmul.msk.bf16.vlgmr.msra.gmra.mxu2 %vm463_vm1, %v1170_v37 }
 0x811   : > { %v1199_v6 = vpop.f32.mrf.mxu2 }
 0x812   : > { %1246 = vrot.lane.b32.xlu2 %v1199_v6, %s1681_s27  ;;  %v1538_v9 = vmul.f32 -1.442695, %v1199_v6 }
 0x814   : > { %1658 = vpow2.f32 %v1538_v9 }
 0x819   : > { %v1201_v8 = vpop.f32.mrf.mxu2 }
 0x81a   : > { %1248 = vrot.lane.b32.xlu2 %v1201_v8, %s1681_s27  ;;  %v1539_v10 = vmul.f32 -1.442695, %v1201_v8  ;;  %v1659_v11 = vpop.eup %1658 }
 0x81b   : > { %v1210_v14 = vadd.f32 1.0, %v1659_v11 }
 0x81c   : > { %1660 = vpow2.f32 %v1539_v10 }
 0x81d   : > { %1662 = vrcp.f32 %v1210_v14  ;;  %vm1217_vm12 = vweird.f32 %v1210_v14  ;;  %v1223_v3 = vand.u32 2147483648, %v1210_v14  ;;  %v1221_v35 = vand.u32 2147483647, %v1210_v14 }
 0x81f   : > { %v1224_v41 = vor.u32 1.1754944e-38, %v1223_v3  ;;  %vm1222_vm0 = vcmp.eq.f32.partialorder %v1221_v35, 8.507059e+37 }
 0x822   : > { %v1661_v13 = vpop.eup %1660 }
 0x823   : > { %v1211_v17 = vadd.f32 1.0, %v1661_v13  ;;  %v1663_v19 = vpop.eup %1662 }
 0x824   : > { %v1213_v21 = vmul.f32 %v1663_v19, %v1210_v14  ;;  %vm1218_vm9 = vweird.f32 %v1663_v19 }
 0x825   : > { %1664 = vrcp.f32 %v1211_v17  ;;  %v1238_v29 = vand.u32 2147483648, %v1211_v17  ;;  %vm1232_vm13 = vweird.f32 %v1211_v17  ;;  %v1236_v34 = vand.u32 2147483647, %v1211_v17  ;;  %vm1219_vm14 = vmor %vm1217_vm12, %vm1218_vm9 }
 0x826   : > { %v1214_v12 = vsub.f32 1.0, %v1213_v21 }
 0x827   : > { %v1239_v5 = vor.u32 1.1754944e-38, %v1238_v29  ;;  %vm1237_vm10 = vcmp.eq.f32.partialorder %v1236_v34, 8.507059e+37 }
 0x828   : > { %v1215_v24 = vmul.f32 %v1663_v19, %v1214_v12 }
 0x82a   : > { %v1216_v28 = vadd.f32 %v1663_v19, %v1215_v24 }
 0x82b   : > { %v1665_v46 = vpop.eup %1664 }
 0x82c   : > { %v1228_v20 = vmul.f32 %v1665_v46, %v1211_v17  ;;  %vm1233_vm11 = vweird.f32 %v1665_v46  ;;  %v1220_v40 = vsel %vm1219_vm14, %v1663_v19, %v1216_v28 }
 0x82d   : > { %vm1234_vm15 = vmor %vm1232_vm13, %vm1233_vm11  ;;  %v1225_v33 = vsel %vm1222_vm0, %v1224_v41, %v1220_v40 }
 0x82e   : > { %v1229_v22 = vsub.f32 1.0, %v1228_v20  ;;  %v1242_v44 = vmul.f32 %v1225_v33, %v1199_v6 }
 0x830   : > { %v1230_v25 = vmul.f32 %v1665_v46, %v1229_v22 }
 0x832   : > { %v1231_v27 = vadd.f32 %v1665_v46, %v1230_v25 }
 0x834   : > { %v1235_v38 = vsel %vm1234_vm15, %v1665_v46, %v1231_v27 }
 0x835   : > { %v1240_v42 = vsel %vm1237_vm10, %v1239_v5, %v1235_v38 }
 0x836   : > { %v1243_v43 = vmul.f32 %v1240_v42, %v1201_v8 }
 0x86c   : > { %v1247_v36 = vpop.permute.xlu2 %1246 }
 0x86d   : > { %v1252_v47 = vmul.f32 %v1247_v36, %v1242_v44 }
 0x874   : > { %v1249_v45 = vpop.permute.xlu2 %1248 }
 0x875   : > { %v1253_v48 = vmul.f32 %v1249_v45, %v1243_v43 }
 0x877   : > { %v1254_v49 = vpack.c.bf16 %v1253_v48, %v1252_v47 }
 0x879   : > { %1556 = vmatmul.msk.bf16.vlgmr.msrb.gmra.mxu3 %vm1287_vm2, %v1254_v49 }
 0x8fc   : > { %v1300_v30 = vpop.f32.mrf.mxu3 }
 0x8fd   : > { %v1305_v50 = vpack.c.bf16 %v1300_v30, %v1300_v30 }
 0x8ff   : > { %v1307_v26 = vunpack.c.l.bf16 %v1305_v50 }
 0x901   : > { %v1309_v51 = vadd.f32 %v1307_v26, %v1977_v23 }
 0x903   : > { %v1311_v52 = vpack.c.bf16 %v1309_v51, %v1309_v51 }
 0x904   : > { %v1302_v53 = vpop.f32.mrf.mxu3 }
 0x905   : > { %1314 = vst.msk [vmem:[#allocation2] sm:$0xf] %vm1313_vm3, %v1311_v52  ;;  %v1306_v55 = vpack.c.bf16 %v1302_v53, %v1302_v53 }
 0x907   : > { %v1308_v56 = vunpack.c.l.bf16 %v1306_v55 }
 0x909   : > { %v1310_v57 = vadd.f32 %v1308_v56, %v1983_v31  ;;  %1319 = sbr.rel (%p1557_p5) target bundleno = 2614 (0xa36), region = 72 }
 0x90b   : > { %v1312_v58 = vpack.c.bf16 %v1310_v57, %v1310_v57 }
 0x90d   : > { %1315 = vst.msk [vmem:[#allocation2 + $0x4] sm:$0xf] %vm1313_vm3, %v1312_v58 }
 0x90e   : > { %v1321_v59 = vunpack.c.l.bf16 %v1311_v52  ;;  %v1322_v61 = vunpack.c.l.bf16 %v1312_v58  ;;  %v1587_v63 = vld [vmem:[%s2038_s10 + $0x8] sm:$0xff]  ;;  %v1586_v31 = vld [vmem:[%s2038_s10] sm:$0xff] }
 0x90f   : > { %1394 = vmatpush.bf16.msra.mxu0 %v1587_v63  ;;  %v1320_v16 = vld [vmem:[%s2037_s9] sm:$0x1] }
 0x910   : > { %v1323_v60 = vmul.f32 %v1321_v59, %v1321_v59  ;;  %v1324_v23 = vmul.f32 %v1322_v61, %v1322_v61  ;;  %v1360_v19 = vpack.i.b16 %v1320_v16, %v1320_v16 }
 0x912   : > { %v1325_v62 = vsel %vm463_vm1, %v1323_v60, 0.0  ;;  %v1328_v54 = vsel %vm463_vm1, %v1324_v23, 0.0  ;;  %v1362_v22 = vperm.slane %v1360_v19, 0 }
 0x913   : > { %1326 = vadd.xlane.f32.xlu0 %v1325_v62  ;;  %1395 = vmatpush.bf16.msra.mxu0 %v1586_v31 }
 0x914   : > { %v1365_v28 = vunpack.c.l.bf16 %v1362_v22 }
 0x91b   : > { %1329 = vadd.xlane.f32.xlu0 %v1328_v54 }
 0x986   : > { %v1327_v0 = vpop.xlane.xlu0 %1326 }
 0x987   : > { %v1331_v1 = vmul.f32 %v1327_v0, %v1808_v15 }
 0x989   : > { %v1333_v2 = vadd.f32 1e-06, %v1331_v1 }
 0x98b   : > { %1666 = vrsqrt.f32 %v1333_v2  ;;  %vm1341_vm5 = vweird.f32 %v1333_v2 }
 0x98e   : > { %v1330_v4 = vpop.xlane.xlu0 %1329 }
 0x98f   : > { %v1332_v32 = vmul.f32 %v1330_v4, %v1808_v15 }
 0x991   : > { %v1667_v37 = vpop.eup %1666  ;;  %v1334_v6 = vadd.f32 1e-06, %v1332_v32 }
 0x992   : > { %v1336_v7 = vmul.f32 %v1667_v37, %v1333_v2  ;;  %vm1342_vm4 = vweird.f32 %v1667_v37 }
 0x993   : > { %1668 = vrsqrt.f32 %v1334_v6  ;;  %vm1343_vm6 = vmor %vm1341_vm5, %vm1342_vm4  ;;  %vm1351_vm8 = vweird.f32 %v1334_v6 }
 0x994   : > { %v1337_v8 = vmul.f32 %v1667_v37, %v1336_v7 }
 0x996   : > { %v1338_v9 = vmul.f32 0.5, %v1337_v8 }
 0x998   : > { %v1339_v10 = vsub.f32 1.5, %v1338_v9 }
 0x999   : > { %v1669_v11 = vpop.eup %1668 }
 0x99a   : > { %v1340_v13 = vmul.f32 %v1667_v37, %v1339_v10  ;;  %v1346_v39 = vmul.f32 %v1669_v11, %v1334_v6  ;;  %vm1352_vm7 = vweird.f32 %v1669_v11 }
 0x99b   : > { %vm1353_vm9 = vmor %vm1351_vm8, %vm1352_vm7 }
 0x99c   : > { %v1347_v14 = vmul.f32 %v1669_v11, %v1346_v39  ;;  %v1344_v17 = vsel %vm1343_vm6, %v1667_v37, %v1340_v13 }
 0x99d   : > { %v1355_v18 = vmul.f32 %v1344_v17, %v1321_v59 }
 0x99e   : > { %v1348_v15 = vmul.f32 0.5, %v1347_v14 }
 0x99f   : > { %v1357_v21 = vpack.c.bf16 %v1355_v18, %v1355_v18 }
 0x9a0   : > { %v1349_v46 = vsub.f32 1.5, %v1348_v15 }
 0x9a1   : > { %v1363_v27 = vunpack.c.l.bf16 %v1357_v21 }
 0x9a2   : > { %v1350_v20 = vmul.f32 %v1669_v11, %v1349_v46 }
 0x9a3   : > { %v1366_v3 = vmul.f32 %v1365_v28, %v1363_v27 }
 0x9a4   : > { %v1354_v12 = vsel %vm1353_vm9, %v1669_v11, %v1350_v20 }
 0x9a5   : > { %v1356_v25 = vmul.f32 %v1354_v12, %v1322_v61 }
 0x9a7   : > { %v1358_v24 = vpack.c.bf16 %v1356_v25, %v1356_v25 }
 0x9a9   : > { %v1364_v29 = vunpack.c.l.bf16 %v1358_v24 }
 0x9ab   : > { %v1367_v34 = vmul.f32 %v1365_v28, %v1364_v29 }
 0x9ad   : > { %v1368_v35 = vpack.c.bf16 %v1367_v34, %v1366_v3 }
 0x9af   : > { %1566 = vmatmul.msk.bf16.vlgmr.msra.gmra.mxu0 %vm463_vm1, %v1368_v35 }
 0xa2c   : > { %v1397_v36 = vpop.f32.mrf.mxu0 }
 0xa2d   : > { %1402 = vst [vmem:[%s2039_s11] sm:$0xff] %v1397_v36 }
 0xa34   : > { %v1399_v38 = vpop.f32.mrf.mxu0 }
 0xa35   : > { %1403 = vst [vmem:[%s2039_s11 + $0x8] sm:$0xff] %v1399_v38 }
 0xa36 PF: > { %s21_s17 = sadd.s32 1, %s1676_s17  }
 0xa37   : > { %p18_p6 = scmp.ge.s32.totalorder %s21_s17, 4  }
 0xa39   :  { %20 = sbr.rel (!%p18_p6) target bundleno = 1 (0x1), region = 110 }

</bundles_post_ra>
